<compile_context>
chip_gen: v7x
topology: tpu7x:2x2x1
jax: 0.10.0
libtpu: 0.0.40
codegen_flags: <defaults>
</compile_context>

<pallas_src>
import jax
import jax.numpy as jnp
from jax import lax
from jax.experimental import pallas as pl
from jax.experimental.pallas import tpu as pltpu

KSIZE = 3
WINSIZE = KSIZE * KSIZE       # slide_winsize (multi_channel=False => 1-ch mask)
GN_GROUPS = 8
GN_EPS = 1e-5
LRELU_SLOPE = 0.01            # nn.LeakyReLU default

# bf16 conv path (perf review): halves HBM traffic of the dominant input and
# of the stage-1 -> stage-2 hand-off; the MXU accumulates in f32 and the whole
# renorm/GroupNorm/LeakyReLU epilogue stays f32.
CONV_DTYPE = jnp.bfloat16


# ----------------------------------------------------------------------------
# Fused kernel: PartialConv2d(3x3, pad=1, stride) -> GroupNorm(8) -> LeakyReLU.
# ----------------------------------------------------------------------------
def _make_stage_kernel(stride, ho, wo, wh, cin, cout):
    """Per-sample fused stage kernel.

    Spatial data is flat on lanes:
      x_ref    [1, s, s, Cin, Lp]   per-phase zero-padded image, Lp = Hh*Wh+tail
      m_ref    [1, s, s, 1,   Lp]   per-phase zero-padded mask
    producing
      y_ref    [1, Cout, L]         L = Ho*Wh (columns j >= Wo of each row are
      mout_ref [1, 1,    L]          garbage; the wrapper slices them off)

    Tap (ki,kj) of output pixel (i,j) reads phase (ki%s, kj%s) at flat offset
    (i + ki//s)*Wh + (j + kj//s) = (i*Wh + j) + const(ki,kj): each tap is ONE
    lane-shifted window of a phase -> 9 small matmuls, no im2col, no scratch.
    """
    lflat = ho * wh
    cnt = float(ho * wo * (cout // GN_GROUPS))

    def kernel(x_ref, m_ref, w_ref, b_ref, gamma_ref, beta_ref,
               gm_gc_ref, gm_cg_ref, valid_ref, y_ref, mout_ref):
        acc = jnp.zeros((cout, lflat), jnp.float32)
        msum = jnp.zeros((1, lflat), jnp.float32)

        # ---- partial conv: 9 shifted-window matmuls, f32 accumulation -------
        for pi in range(stride):
            for pj in range(stride):
                m_ph = m_ref[0, pi, pj]                          # [1, Lp] f32
                x_ph = x_ref[0, pi, pj]                          # [Cin, Lp]
                xm_ph = x_ph * m_ph.astype(x_ph.dtype)           # premultiply
                for ki in range(KSIZE):
                    for kj in range(KSIZE):
                        if (ki % stride) != pi or (kj % stride) != pj:
                            continue
                        off = (ki // stride) * wh + (kj // stride)
                        wt = w_ref[ki * KSIZE + kj]              # [Cout, Cin]
                        xm_win = xm_ph[:, off:off + lflat]       # lane shift
                        acc = acc + lax.dot_general(
                            wt, xm_win, (((1,), (0,)), ((), ())),
                            preferred_element_type=jnp.float32)  # [Cout, L]
                        msum = msum + m_ph[:, off:off + lflat]

        # ---- partial-conv renormalization (NVIDIA, multi_channel=False) -----
        upd = jnp.clip(msum, 0.0, 1.0) * valid_ref[...]          # updated mask
        ratio = (float(WINSIZE) / (msum + 1e-8)) * upd
        out = (acc * ratio + b_ref[...]) * upd                   # [Cout, L] f32

        # ---- GroupNorm(8, Cout): invalid columns are exactly 0 (upd==0) and
        # are excluded by dividing with the true element count. ---------------
        s1 = jnp.sum(out, axis=1, keepdims=True)                 # [Cout, 1]
        s2 = jnp.sum(out * out, axis=1, keepdims=True)           # [Cout, 1]
        s1_g = jnp.dot(gm_gc_ref[...], s1, preferred_element_type=jnp.float32)
        s2_g = jnp.dot(gm_gc_ref[...], s2, preferred_element_type=jnp.float32)
        mean_g = s1_g / cnt
        var_g = jnp.maximum(s2_g / cnt - mean_g * mean_g, 0.0)   # biased var
        istd_g = lax.rsqrt(var_g + GN_EPS)                       # [G, 1]
        mean_c = jnp.dot(gm_cg_ref[...], mean_g, preferred_element_type=jnp.float32)
        istd_c = jnp.dot(gm_cg_ref[...], istd_g, preferred_element_type=jnp.float32)
        a_c = gamma_ref[...] * istd_c                            # [Cout, 1]
        b_c = beta_ref[...] - mean_c * a_c
        y = out * a_c + b_c

        # ---- LeakyReLU + lane-dense stores -----------------------------------
        y = jnp.maximum(y, LRELU_SLOPE * y)
        y_ref[0] = y.astype(y_ref.dtype)
        mout_ref[0] = upd.astype(mout_ref.dtype)

    return kernel


# ----------------------------------------------------------------------------
# Wrapper glue (channels-first throughout; only 1x-traffic pad / phase split).
# ----------------------------------------------------------------------------
def _phase_split(a, s):
    """[N, C, Hp, Wp] -> [N, s, s, C, Hh, Wh]; phase (i, j) = a[:, :, i::s, j::s]."""
    if s == 1:
        return a[:, None, None]
    rows = []
    for i in range(s):
        rows.append(jnp.stack([a[:, :, i::s, j::s] for j in range(s)], axis=1))
    return jnp.stack(rows, axis=1)


def partial_conv_gn_lrelu(x, mask, w, b, gamma, beta, stride, out_dtype):
    n, cin, h, wd = x.shape
    cout = w.shape[0]
    assert cout % GN_GROUPS == 0, "GroupNorm(8, out_ch) needs out_ch % 8 == 0"
    ho = (h + 2 - KSIZE) // stride + 1
    wo = (wd + 2 - KSIZE) // stride + 1

    # zero-pad image and mask by 1 (PartialConv2d zero-pads the mask too), make
    # the padded extent divisible by the stride, then phase-split for stride 2.
    xpad = jnp.pad(x.astype(CONV_DTYPE), ((0, 0), (0, 0), (1, 1), (1, 1)))
    mpad = jnp.pad(mask.astype(jnp.float32), ((0, 0), (0, 0), (1, 1), (1, 1)))
    eh = (-(h + 2)) % stride
    ew = (-(wd + 2)) % stride
    if eh or ew:
        xpad = jnp.pad(xpad, ((0, 0), (0, 0), (0, eh), (0, ew)))
        mpad = jnp.pad(mpad, ((0, 0), (0, 0), (0, eh), (0, ew)))
    xph = _phase_split(xpad, stride)              # [N, s, s, Cin, Hh, Wh]
    mph = _phase_split(mpad, stride)              # [N, s, s, 1,   Hh, Wh]
    hh, wh = xph.shape[-2], xph.shape[-1]

    # flatten spatial (spatial-minor) + tiny zero tail so every tap window fits.
    lflat = ho * wh
    omax = (KSIZE - 1) // stride
    tail = max(0, omax * wh + omax + lflat - hh * wh)
    lp = hh * wh + tail
    xph = xph.reshape(n, stride, stride, cin, hh * wh)
    mph = mph.reshape(n, stride, stride, 1, hh * wh)
    if tail:
        zpad = ((0, 0), (0, 0), (0, 0), (0, 0), (0, tail))
        xph = jnp.pad(xph, zpad)
        mph = jnp.pad(mph, zpad)

    # weights [Cout, Cin, 3, 3] -> per-tap [9, Cout, Cin]; per-channel params.
    w_t = jnp.transpose(w, (2, 3, 0, 1)).reshape(WINSIZE, cout, cin)
    w_t = w_t.astype(CONV_DTYPE)
    b_r = b.reshape(cout, 1).astype(jnp.float32)
    g_r = gamma.reshape(cout, 1).astype(jnp.float32)
    bt_r = beta.reshape(cout, 1).astype(jnp.float32)

    # group indicator matrices for the tiny GroupNorm reduce / scatter matmuls.
    ch_ids = jnp.arange(cout) // (cout // GN_GROUPS)
    gm_cg = (ch_ids[:, None] == jnp.arange(GN_GROUPS)[None, :]).astype(jnp.float32)
    gm_gc = jnp.transpose(gm_cg)

    # validity of flat output columns (j < Wo inside each Wh-wide row).
    valid = ((jnp.arange(lflat) % wh) < wo).astype(jnp.float32).reshape(1, lflat)

    s = stride
    kernel = _make_stage_kernel(s, ho, wo, wh, cin, cout)
    grid_spec = pltpu.PrefetchScalarGridSpec(
        num_scalar_prefetch=0,
        grid=(n,),
        in_specs=[
            pl.BlockSpec((1, s, s, cin, lp), lambda i: (i, 0, 0, 0, 0)),
            pl.BlockSpec((1, s, s, 1, lp), lambda i: (i, 0, 0, 0, 0)),
            pl.BlockSpec((WINSIZE, cout, cin), lambda i: (0, 0, 0)),
            pl.BlockSpec((cout, 1), lambda i: (0, 0)),
            pl.BlockSpec((cout, 1), lambda i: (0, 0)),
            pl.BlockSpec((cout, 1), lambda i: (0, 0)),
            pl.BlockSpec((GN_GROUPS, cout), lambda i: (0, 0)),
            pl.BlockSpec((cout, GN_GROUPS), lambda i: (0, 0)),
            pl.BlockSpec((1, lflat), lambda i: (0, 0)),
        ],
        out_specs=[
            pl.BlockSpec((1, cout, lflat), lambda i: (i, 0, 0)),
            pl.BlockSpec((1, 1, lflat), lambda i: (i, 0, 0)),
        ],
    )
    y_f, m_f = pl.pallas_call(
        kernel,
        out_shape=(jax.ShapeDtypeStruct((n, cout, lflat), out_dtype),
                   jax.ShapeDtypeStruct((n, 1, lflat), jnp.float32)),
        grid_spec=grid_spec,
        compiler_params=pltpu.CompilerParams(
            dimension_semantics=("parallel",),
            vmem_limit_bytes=32 * 1024 * 1024),
    )(xph, mph, w_t, b_r, g_r, bt_r, gm_gc, gm_cg, valid)

    # drop the garbage tail columns (XLA fuses this with the next stage's pad).
    y = y_f.reshape(n, cout, ho, wh)[:, :, :, :wo]
    m_out = m_f.reshape(n, 1, ho, wh)[:, :, :, :wo]
    return y, m_out


def down_block_forward(x, mask, params, return_mask=True):
    if mask is None:
        mask = jnp.ones((x.shape[0], 1) + x.shape[2:], jnp.float32)
    y, m = partial_conv_gn_lrelu(x, mask, params["w1"], params["b1"],
                                 params["gamma1"], params["beta1"],
                                 stride=1, out_dtype=CONV_DTYPE)   # bf16 hand-off
    y, m = partial_conv_gn_lrelu(y, m, params["w2"], params["b2"],
                                 params["gamma2"], params["beta2"],
                                 stride=2, out_dtype=jnp.float32)
    return (y, m) if return_mask else y


# ----------------------------------------------------------------------------
# Pure-JAX reference (numerical verification only).
# ----------------------------------------------------------------------------
def _ref_partial_conv(x, mask, w, b, stride):
    dn = ("NCHW", "OIHW", "NCHW")
    xm = x * mask
    raw = lax.conv_general_dilated(xm, w, (stride, stride), ((1, 1), (1, 1)),
                                   dimension_numbers=dn,
                                   precision=lax.Precision.HIGHEST)
    ones_k = jnp.ones((1, 1, KSIZE, KSIZE), jnp.float32)
    upd = lax.conv_general_dilated(mask, ones_k, (stride, stride), ((1, 1), (1, 1)),
                                   dimension_numbers=dn,
                                   precision=lax.Precision.HIGHEST)
    ratio = WINSIZE / (upd + 1e-8)
    updc = jnp.clip(upd, 0.0, 1.0)
    ratio = ratio * updc
    out = (raw * ratio + b[None, :, None, None]) * updc
    return out, updc


def _ref_groupnorm(x, gamma, beta):
    n, c, h, w = x.shape
    xr = x.reshape(n, GN_GROUPS, c // GN_GROUPS, h, w)
    mean = xr.mean(axis=(2, 3, 4), keepdims=True)
    var = ((xr - mean) ** 2).mean(axis=(2, 3, 4), keepdims=True)
    xn = ((xr - mean) / jnp.sqrt(var + GN_EPS)).reshape(n, c, h, w)
    return xn * gamma[None, :, None, None] + beta[None, :, None, None]


def _ref_lrelu(x):
    return jnp.where(x >= 0, x, LRELU_SLOPE * x)


def down_block_reference(x, mask, params):
    y, m = _ref_partial_conv(x, mask, params["w1"], params["b1"], 1)
    y = _ref_lrelu(_ref_groupnorm(y, params["gamma1"], params["beta1"]))
    y, m = _ref_partial_conv(y, m, params["w2"], params["b2"], 2)
    y = _ref_lrelu(_ref_groupnorm(y, params["gamma2"], params["beta2"]))
    return y, m


# ----------------------------------------------------------------------------
if __name__ == "__main__":
    key = jax.random.PRNGKey(0)
    N, IN_CH, OUT_CH, H, W = 2, 4, 16, 16, 16   # GroupNorm(8, OUT_CH) -> OUT_CH % 8 == 0

    kx, km, k1, k2, k3, k4, k5, k6 = jax.random.split(key, 8)
    x = jax.random.normal(kx, (N, IN_CH, H, W), jnp.float32)
    mask = (jax.random.uniform(km, (N, 1, H, W)) > 0.3).astype(jnp.float32)

    params = {
        "w1": 0.1 * jax.random.normal(k1, (OUT_CH, IN_CH, 3, 3), jnp.float32),
        "b1": 0.05 * jax.random.normal(k2, (OUT_CH,), jnp.float32),
        "gamma1": 1.0 + 0.1 * jax.random.normal(k3, (OUT_CH,), jnp.float32),
        "beta1": 0.1 * jax.random.normal(k3, (OUT_CH,), jnp.float32),
        "w2": 0.1 * jax.random.normal(k4, (OUT_CH, OUT_CH, 3, 3), jnp.float32),
        "b2": 0.05 * jax.random.normal(k5, (OUT_CH,), jnp.float32),
        "gamma2": 1.0 + 0.1 * jax.random.normal(k6, (OUT_CH,), jnp.float32),
        "beta2": 0.1 * jax.random.normal(k6, (OUT_CH,), jnp.float32),
    }

    fwd = jax.jit(down_block_forward)
    y, m_out = jax.block_until_ready(fwd(x, mask, params))
    assert y.shape == (N, OUT_CH, H // 2, W // 2), y.shape
    assert m_out.shape == (N, 1, H // 2, W // 2), m_out.shape

    y_ref, m_ref = jax.block_until_ready(down_block_reference(x, mask, params))
    # mask path is exact (f32 sums of 0/1); conv path runs in bf16 per the perf
    # review, so the activation tolerance accounts for the bf16 MXU + hand-off.
    assert jnp.allclose(m_out, m_ref, atol=1e-6), "mask mismatch"
    y32 = y.astype(jnp.float32)
    max_err = float(jnp.max(jnp.abs(y32 - y_ref)))
    assert jnp.allclose(y32, y_ref, rtol=5e-2, atol=5e-2), (
        "output mismatch, max abs err = %g" % max_err)

    print("KERNEL_OK")
</pallas_src>

<mosaic_0001>
module attributes {stable_mosaic.version = 11 : i64} {
  func.func @kernel(%arg0: i32, %arg1: memref<1x1x1x4x326xbf16, #tpu.memory_space<vmem>>, %arg2: memref<1x1x1x1x326xf32, #tpu.memory_space<vmem>>, %arg3: memref<9x16x4xbf16, #tpu.memory_space<vmem>>, %arg4: memref<16x1xf32, #tpu.memory_space<vmem>>, %arg5: memref<16x1xf32, #tpu.memory_space<vmem>>, %arg6: memref<16x1xf32, #tpu.memory_space<vmem>>, %arg7: memref<8x16xf32, #tpu.memory_space<vmem>>, %arg8: memref<16x8xf32, #tpu.memory_space<vmem>>, %arg9: memref<1x288xf32, #tpu.memory_space<vmem>>, %arg10: memref<1x16x288xbf16, #tpu.memory_space<vmem>>, %arg11: memref<1x1x288xf32, #tpu.memory_space<vmem>>) attributes {dimension_semantics = [#tpu.dimension_semantics<parallel>], iteration_bounds = array<i64: 2>, scalar_prefetch = 0 : i64, scratch_operands = 0 : i64, tpu.core_type = #tpu.core_type<tc>, window_params = [{transform_indices = @transform_0, window_bounds = array<i64: 1, 1, 1, 4, 326>}, {transform_indices = @transform_1, window_bounds = array<i64: 1, 1, 1, 1, 326>}, {pipeline_mode = #tpu.pipeline_mode<synchronous>, transform_indices = @transform_2, window_bounds = array<i64: 9, 16, 4>}, {pipeline_mode = #tpu.pipeline_mode<synchronous>, transform_indices = @transform_3, window_bounds = array<i64: 16, 1>}, {pipeline_mode = #tpu.pipeline_mode<synchronous>, transform_indices = @transform_4, window_bounds = array<i64: 16, 1>}, {pipeline_mode = #tpu.pipeline_mode<synchronous>, transform_indices = @transform_5, window_bounds = array<i64: 16, 1>}, {pipeline_mode = #tpu.pipeline_mode<synchronous>, transform_indices = @transform_6, window_bounds = array<i64: 8, 16>}, {pipeline_mode = #tpu.pipeline_mode<synchronous>, transform_indices = @transform_7, window_bounds = array<i64: 16, 8>}, {pipeline_mode = #tpu.pipeline_mode<synchronous>, transform_indices = @transform_8, window_bounds = array<i64: 1, 288>}, {transform_indices = @transform_9, window_bounds = array<i64: 1, 16, 288>}, {transform_indices = @transform_10, window_bounds = array<i64: 1, 1, 288>}]} {
    %cst = arith.constant 0.000000e+00 : f32
    %0 = vector.broadcast %cst : f32 to vector<16x288xf32>
    %cst_0 = arith.constant 0.000000e+00 : f32
    %1 = vector.broadcast %cst_0 : f32 to vector<1x288xf32>
    %c0 = arith.constant 0 : index
    %c0_1 = arith.constant 0 : index
    %c0_2 = arith.constant 0 : index
    %c0_3 = arith.constant 0 : index
    %c0_4 = arith.constant 0 : index
    %2 = vector.load %arg2[%c0, %c0_1, %c0_2, %c0_3, %c0_4] : memref<1x1x1x1x326xf32, #tpu.memory_space<vmem>>, vector<1x1x1x1x326xf32>
    %3 = vector.shape_cast %2 : vector<1x1x1x1x326xf32> to vector<1x326xf32>
    %c0_5 = arith.constant 0 : index
    %c0_6 = arith.constant 0 : index
    %c0_7 = arith.constant 0 : index
    %c0_8 = arith.constant 0 : index
    %c0_9 = arith.constant 0 : index
    %4 = vector.load %arg1[%c0_5, %c0_6, %c0_7, %c0_8, %c0_9] : memref<1x1x1x4x326xbf16, #tpu.memory_space<vmem>>, vector<1x1x1x4x326xbf16>
    %5 = vector.shape_cast %4 : vector<1x1x1x4x326xbf16> to vector<4x326xbf16>
    %6 = arith.truncf %3 : vector<1x326xf32> to vector<1x326xbf16>
    %7 = vector.broadcast %6 : vector<1x326xbf16> to vector<4x326xbf16>
    %8 = arith.mulf %5, %7 : vector<4x326xbf16>
    %c0_10 = arith.constant 0 : index
    %c0_11 = arith.constant 0 : index
    %c0_12 = arith.constant 0 : index
    %9 = vector.load %arg3[%c0_10, %c0_11, %c0_12] : memref<9x16x4xbf16, #tpu.memory_space<vmem>>, vector<1x16x4xbf16>
    %10 = vector.shape_cast %9 : vector<1x16x4xbf16> to vector<16x4xbf16>
    %11 = vector.extract_strided_slice %8 {offsets = [0, 0], sizes = [4, 288], strides = [1, 1]} : vector<4x326xbf16> to vector<4x288xbf16>
    %cst_13 = arith.constant dense<0.000000e+00> : vector<16x288xf32>
    %12 = tpu.matmul %10, %11, %cst_13 {dimension_numbers = #tpu.dot_dimension_numbers<[1], [0], [0], [1], [0, 0, 1, 1], [], []>} : vector<16x4xbf16>, vector<4x288xbf16>, vector<16x288xf32> -> vector<16x288xf32>
    %13 = arith.addf %0, %12 : vector<16x288xf32>
    %14 = vector.extract_strided_slice %3 {offsets = [0, 0], sizes = [1, 288], strides = [1, 1]} : vector<1x326xf32> to vector<1x288xf32>
    %15 = arith.addf %1, %14 : vector<1x288xf32>
    %c1 = arith.constant 1 : index
    %c0_14 = arith.constant 0 : index
    %c0_15 = arith.constant 0 : index
    %16 = vector.load %arg3[%c1, %c0_14, %c0_15] : memref<9x16x4xbf16, #tpu.memory_space<vmem>>, vector<1x16x4xbf16>
    %17 = vector.shape_cast %16 : vector<1x16x4xbf16> to vector<16x4xbf16>
    %18 = vector.extract_strided_slice %8 {offsets = [0, 1], sizes = [4, 288], strides = [1, 1]} : vector<4x326xbf16> to vector<4x288xbf16>
    %cst_16 = arith.constant dense<0.000000e+00> : vector<16x288xf32>
    %19 = tpu.matmul %17, %18, %cst_16 {dimension_numbers = #tpu.dot_dimension_numbers<[1], [0], [0], [1], [0, 0, 1, 1], [], []>} : vector<16x4xbf16>, vector<4x288xbf16>, vector<16x288xf32> -> vector<16x288xf32>
    %20 = arith.addf %13, %19 : vector<16x288xf32>
    %21 = vector.extract_strided_slice %3 {offsets = [0, 1], sizes = [1, 288], strides = [1, 1]} : vector<1x326xf32> to vector<1x288xf32>
    %22 = arith.addf %15, %21 : vector<1x288xf32>
    %c2 = arith.constant 2 : index
    %c0_17 = arith.constant 0 : index
    %c0_18 = arith.constant 0 : index
    %23 = vector.load %arg3[%c2, %c0_17, %c0_18] : memref<9x16x4xbf16, #tpu.memory_space<vmem>>, vector<1x16x4xbf16>
    %24 = vector.shape_cast %23 : vector<1x16x4xbf16> to vector<16x4xbf16>
    %25 = vector.extract_strided_slice %8 {offsets = [0, 2], sizes = [4, 288], strides = [1, 1]} : vector<4x326xbf16> to vector<4x288xbf16>
    %cst_19 = arith.constant dense<0.000000e+00> : vector<16x288xf32>
    %26 = tpu.matmul %24, %25, %cst_19 {dimension_numbers = #tpu.dot_dimension_numbers<[1], [0], [0], [1], [0, 0, 1, 1], [], []>} : vector<16x4xbf16>, vector<4x288xbf16>, vector<16x288xf32> -> vector<16x288xf32>
    %27 = arith.addf %20, %26 : vector<16x288xf32>
    %28 = vector.extract_strided_slice %3 {offsets = [0, 2], sizes = [1, 288], strides = [1, 1]} : vector<1x326xf32> to vector<1x288xf32>
    %29 = arith.addf %22, %28 : vector<1x288xf32>
    %c3 = arith.constant 3 : index
    %c0_20 = arith.constant 0 : index
    %c0_21 = arith.constant 0 : index
    %30 = vector.load %arg3[%c3, %c0_20, %c0_21] : memref<9x16x4xbf16, #tpu.memory_space<vmem>>, vector<1x16x4xbf16>
    %31 = vector.shape_cast %30 : vector<1x16x4xbf16> to vector<16x4xbf16>
    %32 = vector.extract_strided_slice %8 {offsets = [0, 18], sizes = [4, 288], strides = [1, 1]} : vector<4x326xbf16> to vector<4x288xbf16>
    %cst_22 = arith.constant dense<0.000000e+00> : vector<16x288xf32>
    %33 = tpu.matmul %31, %32, %cst_22 {dimension_numbers = #tpu.dot_dimension_numbers<[1], [0], [0], [1], [0, 0, 1, 1], [], []>} : vector<16x4xbf16>, vector<4x288xbf16>, vector<16x288xf32> -> vector<16x288xf32>
    %34 = arith.addf %27, %33 : vector<16x288xf32>
    %35 = vector.extract_strided_slice %3 {offsets = [0, 18], sizes = [1, 288], strides = [1, 1]} : vector<1x326xf32> to vector<1x288xf32>
    %36 = arith.addf %29, %35 : vector<1x288xf32>
    %c4 = arith.constant 4 : index
    %c0_23 = arith.constant 0 : index
    %c0_24 = arith.constant 0 : index
    %37 = vector.load %arg3[%c4, %c0_23, %c0_24] : memref<9x16x4xbf16, #tpu.memory_space<vmem>>, vector<1x16x4xbf16>
    %38 = vector.shape_cast %37 : vector<1x16x4xbf16> to vector<16x4xbf16>
    %39 = vector.extract_strided_slice %8 {offsets = [0, 19], sizes = [4, 288], strides = [1, 1]} : vector<4x326xbf16> to vector<4x288xbf16>
    %cst_25 = arith.constant dense<0.000000e+00> : vector<16x288xf32>
    %40 = tpu.matmul %38, %39, %cst_25 {dimension_numbers = #tpu.dot_dimension_numbers<[1], [0], [0], [1], [0, 0, 1, 1], [], []>} : vector<16x4xbf16>, vector<4x288xbf16>, vector<16x288xf32> -> vector<16x288xf32>
    %41 = arith.addf %34, %40 : vector<16x288xf32>
    %42 = vector.extract_strided_slice %3 {offsets = [0, 19], sizes = [1, 288], strides = [1, 1]} : vector<1x326xf32> to vector<1x288xf32>
    %43 = arith.addf %36, %42 : vector<1x288xf32>
    %c5 = arith.constant 5 : index
    %c0_26 = arith.constant 0 : index
    %c0_27 = arith.constant 0 : index
    %44 = vector.load %arg3[%c5, %c0_26, %c0_27] : memref<9x16x4xbf16, #tpu.memory_space<vmem>>, vector<1x16x4xbf16>
    %45 = vector.shape_cast %44 : vector<1x16x4xbf16> to vector<16x4xbf16>
    %46 = vector.extract_strided_slice %8 {offsets = [0, 20], sizes = [4, 288], strides = [1, 1]} : vector<4x326xbf16> to vector<4x288xbf16>
    %cst_28 = arith.constant dense<0.000000e+00> : vector<16x288xf32>
    %47 = tpu.matmul %45, %46, %cst_28 {dimension_numbers = #tpu.dot_dimension_numbers<[1], [0], [0], [1], [0, 0, 1, 1], [], []>} : vector<16x4xbf16>, vector<4x288xbf16>, vector<16x288xf32> -> vector<16x288xf32>
    %48 = arith.addf %41, %47 : vector<16x288xf32>
    %49 = vector.extract_strided_slice %3 {offsets = [0, 20], sizes = [1, 288], strides = [1, 1]} : vector<1x326xf32> to vector<1x288xf32>
    %50 = arith.addf %43, %49 : vector<1x288xf32>
    %c6 = arith.constant 6 : index
    %c0_29 = arith.constant 0 : index
    %c0_30 = arith.constant 0 : index
    %51 = vector.load %arg3[%c6, %c0_29, %c0_30] : memref<9x16x4xbf16, #tpu.memory_space<vmem>>, vector<1x16x4xbf16>
    %52 = vector.shape_cast %51 : vector<1x16x4xbf16> to vector<16x4xbf16>
    %53 = vector.extract_strided_slice %8 {offsets = [0, 36], sizes = [4, 288], strides = [1, 1]} : vector<4x326xbf16> to vector<4x288xbf16>
    %cst_31 = arith.constant dense<0.000000e+00> : vector<16x288xf32>
    %54 = tpu.matmul %52, %53, %cst_31 {dimension_numbers = #tpu.dot_dimension_numbers<[1], [0], [0], [1], [0, 0, 1, 1], [], []>} : vector<16x4xbf16>, vector<4x288xbf16>, vector<16x288xf32> -> vector<16x288xf32>
    %55 = arith.addf %48, %54 : vector<16x288xf32>
    %56 = vector.extract_strided_slice %3 {offsets = [0, 36], sizes = [1, 288], strides = [1, 1]} : vector<1x326xf32> to vector<1x288xf32>
    %57 = arith.addf %50, %56 : vector<1x288xf32>
    %c7 = arith.constant 7 : index
    %c0_32 = arith.constant 0 : index
    %c0_33 = arith.constant 0 : index
    %58 = vector.load %arg3[%c7, %c0_32, %c0_33] : memref<9x16x4xbf16, #tpu.memory_space<vmem>>, vector<1x16x4xbf16>
    %59 = vector.shape_cast %58 : vector<1x16x4xbf16> to vector<16x4xbf16>
    %60 = vector.extract_strided_slice %8 {offsets = [0, 37], sizes = [4, 288], strides = [1, 1]} : vector<4x326xbf16> to vector<4x288xbf16>
    %cst_34 = arith.constant dense<0.000000e+00> : vector<16x288xf32>
    %61 = tpu.matmul %59, %60, %cst_34 {dimension_numbers = #tpu.dot_dimension_numbers<[1], [0], [0], [1], [0, 0, 1, 1], [], []>} : vector<16x4xbf16>, vector<4x288xbf16>, vector<16x288xf32> -> vector<16x288xf32>
    %62 = arith.addf %55, %61 : vector<16x288xf32>
    %63 = vector.extract_strided_slice %3 {offsets = [0, 37], sizes = [1, 288], strides = [1, 1]} : vector<1x326xf32> to vector<1x288xf32>
    %64 = arith.addf %57, %63 : vector<1x288xf32>
    %c8 = arith.constant 8 : index
    %c0_35 = arith.constant 0 : index
    %c0_36 = arith.constant 0 : index
    %65 = vector.load %arg3[%c8, %c0_35, %c0_36] : memref<9x16x4xbf16, #tpu.memory_space<vmem>>, vector<1x16x4xbf16>
    %66 = vector.shape_cast %65 : vector<1x16x4xbf16> to vector<16x4xbf16>
    %67 = vector.extract_strided_slice %8 {offsets = [0, 38], sizes = [4, 288], strides = [1, 1]} : vector<4x326xbf16> to vector<4x288xbf16>
    %cst_37 = arith.constant dense<0.000000e+00> : vector<16x288xf32>
    %68 = tpu.matmul %66, %67, %cst_37 {dimension_numbers = #tpu.dot_dimension_numbers<[1], [0], [0], [1], [0, 0, 1, 1], [], []>} : vector<16x4xbf16>, vector<4x288xbf16>, vector<16x288xf32> -> vector<16x288xf32>
    %69 = arith.addf %62, %68 : vector<16x288xf32>
    %70 = vector.extract_strided_slice %3 {offsets = [0, 38], sizes = [1, 288], strides = [1, 1]} : vector<1x326xf32> to vector<1x288xf32>
    %71 = arith.addf %64, %70 : vector<1x288xf32>
    %cst_38 = arith.constant 0.000000e+00 : f32
    %cst_39 = arith.constant 1.000000e+00 : f32
    %72 = vector.broadcast %cst_38 : f32 to vector<1x288xf32>
    %73 = arith.maximumf %72, %71 : vector<1x288xf32>
    %74 = vector.broadcast %cst_39 : f32 to vector<1x288xf32>
    %75 = arith.minimumf %74, %73 : vector<1x288xf32>
    %c0_40 = arith.constant 0 : index
    %c0_41 = arith.constant 0 : index
    %76 = vector.load %arg9[%c0_40, %c0_41] : memref<1x288xf32, #tpu.memory_space<vmem>>, vector<1x288xf32>
    %77 = arith.mulf %75, %76 : vector<1x288xf32>
    %cst_42 = arith.constant 9.99999993E-9 : f32
    %78 = vector.broadcast %cst_42 : f32 to vector<1x288xf32>
    %79 = arith.addf %71, %78 : vector<1x288xf32>
    %cst_43 = arith.constant 9.000000e+00 : f32
    %80 = vector.broadcast %cst_43 : f32 to vector<1x288xf32>
    %81 = arith.divf %80, %79 : vector<1x288xf32>
    %82 = arith.mulf %81, %77 : vector<1x288xf32>
    %83 = vector.broadcast %82 : vector<1x288xf32> to vector<16x288xf32>
    %84 = arith.mulf %69, %83 : vector<16x288xf32>
    %c0_44 = arith.constant 0 : index
    %c0_45 = arith.constant 0 : index
    %85 = vector.load %arg4[%c0_44, %c0_45] : memref<16x1xf32, #tpu.memory_space<vmem>>, vector<16x1xf32>
    %86 = vector.broadcast %85 : vector<16x1xf32> to vector<16x288xf32>
    %87 = arith.addf %84, %86 : vector<16x288xf32>
    %88 = vector.broadcast %77 : vector<1x288xf32> to vector<16x288xf32>
    %89 = arith.mulf %87, %88 : vector<16x288xf32>
    %cst_46 = arith.constant dense<0.000000e+00> : vector<16xf32>
    %90 = vector.multi_reduction <add>, %89, %cst_46 [1] : vector<16x288xf32> to vector<16xf32>
    %91 = vector.shape_cast %90 : vector<16xf32> to vector<16x1xf32>
    %92 = arith.mulf %89, %89 : vector<16x288xf32>
    %cst_47 = arith.constant dense<0.000000e+00> : vector<16xf32>
    %93 = vector.multi_reduction <add>, %92, %cst_47 [1] : vector<16x288xf32> to vector<16xf32>
    %94 = vector.shape_cast %93 : vector<16xf32> to vector<16x1xf32>
    %c0_48 = arith.constant 0 : index
    %c0_49 = arith.constant 0 : index
    %95 = vector.load %arg7[%c0_48, %c0_49] : memref<8x16xf32, #tpu.memory_space<vmem>>, vector<8x16xf32>
    %cst_50 = arith.constant dense<0.000000e+00> : vector<8x1xf32>
    %96 = tpu.matmul %95, %91, %cst_50 {dimension_numbers = #tpu.dot_dimension_numbers<[1], [0], [0], [1], [0, 0, 1, 1], [], []>} : vector<8x16xf32>, vector<16x1xf32>, vector<8x1xf32> -> vector<8x1xf32>
    %c0_51 = arith.constant 0 : index
    %c0_52 = arith.constant 0 : index
    %97 = vector.load %arg7[%c0_51, %c0_52] : memref<8x16xf32, #tpu.memory_space<vmem>>, vector<8x16xf32>
    %cst_53 = arith.constant dense<0.000000e+00> : vector<8x1xf32>
    %98 = tpu.matmul %97, %94, %cst_53 {dimension_numbers = #tpu.dot_dimension_numbers<[1], [0], [0], [1], [0, 0, 1, 1], [], []>} : vector<8x16xf32>, vector<16x1xf32>, vector<8x1xf32> -> vector<8x1xf32>
    %cst_54 = arith.constant 5.120000e+02 : f32
    %99 = vector.broadcast %cst_54 : f32 to vector<8x1xf32>
    %100 = arith.divf %96, %99 : vector<8x1xf32>
    %cst_55 = arith.constant 5.120000e+02 : f32
    %101 = vector.broadcast %cst_55 : f32 to vector<8x1xf32>
    %102 = arith.divf %98, %101 : vector<8x1xf32>
    %103 = arith.mulf %100, %100 : vector<8x1xf32>
    %104 = arith.subf %102, %103 : vector<8x1xf32>
    %cst_56 = arith.constant 0.000000e+00 : f32
    %105 = vector.broadcast %cst_56 : f32 to vector<8x1xf32>
    %106 = arith.maximumf %104, %105 : vector<8x1xf32>
    %cst_57 = arith.constant 9.99999974E-6 : f32
    %107 = vector.broadcast %cst_57 : f32 to vector<8x1xf32>
    %108 = arith.addf %106, %107 : vector<8x1xf32>
    %109 = math.rsqrt %108 : vector<8x1xf32>
    %c0_58 = arith.constant 0 : index
    %c0_59 = arith.constant 0 : index
    %110 = vector.load %arg8[%c0_58, %c0_59] : memref<16x8xf32, #tpu.memory_space<vmem>>, vector<16x8xf32>
    %cst_60 = arith.constant dense<0.000000e+00> : vector<16x1xf32>
    %111 = tpu.matmul %110, %100, %cst_60 {dimension_numbers = #tpu.dot_dimension_numbers<[1], [0], [0], [1], [0, 0, 1, 1], [], []>} : vector<16x8xf32>, vector<8x1xf32>, vector<16x1xf32> -> vector<16x1xf32>
    %c0_61 = arith.constant 0 : index
    %c0_62 = arith.constant 0 : index
    %112 = vector.load %arg8[%c0_61, %c0_62] : memref<16x8xf32, #tpu.memory_space<vmem>>, vector<16x8xf32>
    %cst_63 = arith.constant dense<0.000000e+00> : vector<16x1xf32>
    %113 = tpu.matmul %112, %109, %cst_63 {dimension_numbers = #tpu.dot_dimension_numbers<[1], [0], [0], [1], [0, 0, 1, 1], [], []>} : vector<16x8xf32>, vector<8x1xf32>, vector<16x1xf32> -> vector<16x1xf32>
    %c0_64 = arith.constant 0 : index
    %c0_65 = arith.constant 0 : index
    %114 = vector.load %arg5[%c0_64, %c0_65] : memref<16x1xf32, #tpu.memory_space<vmem>>, vector<16x1xf32>
    %115 = arith.mulf %114, %113 : vector<16x1xf32>
    %c0_66 = arith.constant 0 : index
    %c0_67 = arith.constant 0 : index
    %116 = vector.load %arg6[%c0_66, %c0_67] : memref<16x1xf32, #tpu.memory_space<vmem>>, vector<16x1xf32>
    %117 = arith.mulf %111, %115 : vector<16x1xf32>
    %118 = arith.subf %116, %117 : vector<16x1xf32>
    %119 = vector.broadcast %115 : vector<16x1xf32> to vector<16x288xf32>
    %120 = arith.mulf %89, %119 : vector<16x288xf32>
    %121 = vector.broadcast %118 : vector<16x1xf32> to vector<16x288xf32>
    %122 = arith.addf %120, %121 : vector<16x288xf32>
    %cst_68 = arith.constant 0.00999999977 : f32
    %123 = vector.broadcast %cst_68 : f32 to vector<16x288xf32>
    %124 = arith.mulf %123, %122 : vector<16x288xf32>
    %125 = arith.maximumf %122, %124 : vector<16x288xf32>
    %126 = arith.truncf %125 : vector<16x288xf32> to vector<16x288xbf16>
    %c0_69 = arith.constant 0 : index
    %c0_70 = arith.constant 0 : index
    %c0_71 = arith.constant 0 : index
    %127 = vector.load %arg10[%c0_69, %c0_70, %c0_71] : memref<1x16x288xbf16, #tpu.memory_space<vmem>>, vector<1x16x288xbf16>
    %128 = vector.shape_cast %127 : vector<1x16x288xbf16> to vector<16x288xbf16>
    %129 = vector.shape_cast %126 : vector<16x288xbf16> to vector<1x16x288xbf16>
    tpu.vector_store %arg10[%c0_69, %c0_70, %c0_71], %129 {strides = array<i32>} : memref<1x16x288xbf16, #tpu.memory_space<vmem>>, vector<1x16x288xbf16>,
    %c0_72 = arith.constant 0 : index
    %c0_73 = arith.constant 0 : index
    %c0_74 = arith.constant 0 : index
    %130 = vector.load %arg11[%c0_72, %c0_73, %c0_74] : memref<1x1x288xf32, #tpu.memory_space<vmem>>, vector<1x1x288xf32>
    %131 = vector.shape_cast %130 : vector<1x1x288xf32> to vector<1x288xf32>
    %132 = vector.shape_cast %77 : vector<1x288xf32> to vector<1x1x288xf32>
    tpu.vector_store %arg11[%c0_72, %c0_73, %c0_74], %132 {strides = array<i32>} : memref<1x1x288xf32, #tpu.memory_space<vmem>>, vector<1x1x288xf32>,
    return
  }
  func.func @transform_0(%arg0: i32) -> (i32, i32, i32, i32, i32) {
    %c0_i32 = arith.constant 0 : i32
    %c0_i32_0 = arith.constant 0 : i32
    %c0_i32_1 = arith.constant 0 : i32
    %c0_i32_2 = arith.constant 0 : i32
    %c0_i32_3 = arith.constant 0 : i32
    return %arg0, %c0_i32, %c0_i32_0, %c0_i32_1, %c0_i32_2 : i32, i32, i32, i32, i32
  }
  func.func @transform_1(%arg0: i32) -> (i32, i32, i32, i32, i32) {
    %c0_i32 = arith.constant 0 : i32
    %c0_i32_0 = arith.constant 0 : i32
    %c0_i32_1 = arith.constant 0 : i32
    %c0_i32_2 = arith.constant 0 : i32
    %c0_i32_3 = arith.constant 0 : i32
    return %arg0, %c0_i32, %c0_i32_0, %c0_i32_1, %c0_i32_2 : i32, i32, i32, i32, i32
  }
  func.func @transform_2(%arg0: i32) -> (i32, i32, i32) {
    %c0_i32 = arith.constant 0 : i32
    %c0_i32_0 = arith.constant 0 : i32
    %c0_i32_1 = arith.constant 0 : i32
    %c0_i32_2 = arith.constant 0 : i32
    return %c0_i32, %c0_i32_0, %c0_i32_1 : i32, i32, i32
  }
  func.func @transform_3(%arg0: i32) -> (i32, i32) {
    %c0_i32 = arith.constant 0 : i32
    %c0_i32_0 = arith.constant 0 : i32
    %c0_i32_1 = arith.constant 0 : i32
    return %c0_i32, %c0_i32_0 : i32, i32
  }
  func.func @transform_4(%arg0: i32) -> (i32, i32) {
    %c0_i32 = arith.constant 0 : i32
    %c0_i32_0 = arith.constant 0 : i32
    %c0_i32_1 = arith.constant 0 : i32
    return %c0_i32, %c0_i32_0 : i32, i32
  }
  func.func @transform_5(%arg0: i32) -> (i32, i32) {
    %c0_i32 = arith.constant 0 : i32
    %c0_i32_0 = arith.constant 0 : i32
    %c0_i32_1 = arith.constant 0 : i32
    return %c0_i32, %c0_i32_0 : i32, i32
  }
  func.func @transform_6(%arg0: i32) -> (i32, i32) {
    %c0_i32 = arith.constant 0 : i32
    %c0_i32_0 = arith.constant 0 : i32
    %c0_i32_1 = arith.constant 0 : i32
    return %c0_i32, %c0_i32_0 : i32, i32
  }
  func.func @transform_7(%arg0: i32) -> (i32, i32) {
    %c0_i32 = arith.constant 0 : i32
    %c0_i32_0 = arith.constant 0 : i32
    %c0_i32_1 = arith.constant 0 : i32
    return %c0_i32, %c0_i32_0 : i32, i32
  }
  func.func @transform_8(%arg0: i32) -> (i32, i32) {
    %c0_i32 = arith.constant 0 : i32
    %c0_i32_0 = arith.constant 0 : i32
    %c0_i32_1 = arith.constant 0 : i32
    return %c0_i32, %c0_i32_0 : i32, i32
  }
  func.func @transform_9(%arg0: i32) -> (i32, i32, i32) {
    %c0_i32 = arith.constant 0 : i32
    %c0_i32_0 = arith.constant 0 : i32
    %c0_i32_1 = arith.constant 0 : i32
    return %arg0, %c0_i32, %c0_i32_0 : i32, i32, i32
  }
  func.func @transform_10(%arg0: i32) -> (i32, i32, i32) {
    %c0_i32 = arith.constant 0 : i32
    %c0_i32_0 = arith.constant 0 : i32
    %c0_i32_1 = arith.constant 0 : i32
    return %arg0, %c0_i32, %c0_i32_0 : i32, i32, i32
  }
}

module attributes {stable_mosaic.version = 11 : i64} {
  func.func @kernel(%arg0: i32, %arg1: memref<1x2x2x16x82xbf16, #tpu.memory_space<vmem>>, %arg2: memref<1x2x2x1x82xf32, #tpu.memory_space<vmem>>, %arg3: memref<9x16x16xbf16, #tpu.memory_space<vmem>>, %arg4: memref<16x1xf32, #tpu.memory_space<vmem>>, %arg5: memref<16x1xf32, #tpu.memory_space<vmem>>, %arg6: memref<16x1xf32, #tpu.memory_space<vmem>>, %arg7: memref<8x16xf32, #tpu.memory_space<vmem>>, %arg8: memref<16x8xf32, #tpu.memory_space<vmem>>, %arg9: memref<1x72xf32, #tpu.memory_space<vmem>>, %arg10: memref<1x16x72xf32, #tpu.memory_space<vmem>>, %arg11: memref<1x1x72xf32, #tpu.memory_space<vmem>>) attributes {dimension_semantics = [#tpu.dimension_semantics<parallel>], iteration_bounds = array<i64: 2>, scalar_prefetch = 0 : i64, scratch_operands = 0 : i64, tpu.core_type = #tpu.core_type<tc>, window_params = [{transform_indices = @transform_0, window_bounds = array<i64: 1, 2, 2, 16, 82>}, {transform_indices = @transform_1, window_bounds = array<i64: 1, 2, 2, 1, 82>}, {pipeline_mode = #tpu.pipeline_mode<synchronous>, transform_indices = @transform_2, window_bounds = array<i64: 9, 16, 16>}, {pipeline_mode = #tpu.pipeline_mode<synchronous>, transform_indices = @transform_3, window_bounds = array<i64: 16, 1>}, {pipeline_mode = #tpu.pipeline_mode<synchronous>, transform_indices = @transform_4, window_bounds = array<i64: 16, 1>}, {pipeline_mode = #tpu.pipeline_mode<synchronous>, transform_indices = @transform_5, window_bounds = array<i64: 16, 1>}, {pipeline_mode = #tpu.pipeline_mode<synchronous>, transform_indices = @transform_6, window_bounds = array<i64: 8, 16>}, {pipeline_mode = #tpu.pipeline_mode<synchronous>, transform_indices = @transform_7, window_bounds = array<i64: 16, 8>}, {pipeline_mode = #tpu.pipeline_mode<synchronous>, transform_indices = @transform_8, window_bounds = array<i64: 1, 72>}, {transform_indices = @transform_9, window_bounds = array<i64: 1, 16, 72>}, {transform_indices = @transform_10, window_bounds = array<i64: 1, 1, 72>}]} {
    %cst = arith.constant 0.000000e+00 : f32
    %0 = vector.broadcast %cst : f32 to vector<16x72xf32>
    %cst_0 = arith.constant 0.000000e+00 : f32
    %1 = vector.broadcast %cst_0 : f32 to vector<1x72xf32>
    %c0 = arith.constant 0 : index
    %c0_1 = arith.constant 0 : index
    %c0_2 = arith.constant 0 : index
    %c0_3 = arith.constant 0 : index
    %c0_4 = arith.constant 0 : index
    %2 = vector.load %arg2[%c0, %c0_1, %c0_2, %c0_3, %c0_4] : memref<1x2x2x1x82xf32, #tpu.memory_space<vmem>>, vector<1x1x1x1x82xf32>
    %3 = vector.shape_cast %2 : vector<1x1x1x1x82xf32> to vector<1x82xf32>
    %c0_5 = arith.constant 0 : index
    %c0_6 = arith.constant 0 : index
    %c0_7 = arith.constant 0 : index
    %c0_8 = arith.constant 0 : index
    %c0_9 = arith.constant 0 : index
    %4 = vector.load %arg1[%c0_5, %c0_6, %c0_7, %c0_8, %c0_9] : memref<1x2x2x16x82xbf16, #tpu.memory_space<vmem>>, vector<1x1x1x16x82xbf16>
    %5 = vector.shape_cast %4 : vector<1x1x1x16x82xbf16> to vector<16x82xbf16>
    %6 = arith.truncf %3 : vector<1x82xf32> to vector<1x82xbf16>
    %7 = vector.broadcast %6 : vector<1x82xbf16> to vector<16x82xbf16>
    %8 = arith.mulf %5, %7 : vector<16x82xbf16>
    %c0_10 = arith.constant 0 : index
    %c0_11 = arith.constant 0 : index
    %c0_12 = arith.constant 0 : index
    %9 = vector.load %arg3[%c0_10, %c0_11, %c0_12] : memref<9x16x16xbf16, #tpu.memory_space<vmem>>, vector<1x16x16xbf16>
    %10 = vector.shape_cast %9 : vector<1x16x16xbf16> to vector<16x16xbf16>
    %11 = vector.extract_strided_slice %8 {offsets = [0, 0], sizes = [16, 72], strides = [1, 1]} : vector<16x82xbf16> to vector<16x72xbf16>
    %cst_13 = arith.constant dense<0.000000e+00> : vector<16x72xf32>
    %12 = tpu.matmul %10, %11, %cst_13 {dimension_numbers = #tpu.dot_dimension_numbers<[1], [0], [0], [1], [0, 0, 1, 1], [], []>} : vector<16x16xbf16>, vector<16x72xbf16>, vector<16x72xf32> -> vector<16x72xf32>
    %13 = arith.addf %0, %12 : vector<16x72xf32>
    %14 = vector.extract_strided_slice %3 {offsets = [0, 0], sizes = [1, 72], strides = [1, 1]} : vector<1x82xf32> to vector<1x72xf32>
    %15 = arith.addf %1, %14 : vector<1x72xf32>
    %c2 = arith.constant 2 : index
    %c0_14 = arith.constant 0 : index
    %c0_15 = arith.constant 0 : index
    %16 = vector.load %arg3[%c2, %c0_14, %c0_15] : memref<9x16x16xbf16, #tpu.memory_space<vmem>>, vector<1x16x16xbf16>
    %17 = vector.shape_cast %16 : vector<1x16x16xbf16> to vector<16x16xbf16>
    %18 = vector.extract_strided_slice %8 {offsets = [0, 1], sizes = [16, 72], strides = [1, 1]} : vector<16x82xbf16> to vector<16x72xbf16>
    %cst_16 = arith.constant dense<0.000000e+00> : vector<16x72xf32>
    %19 = tpu.matmul %17, %18, %cst_16 {dimension_numbers = #tpu.dot_dimension_numbers<[1], [0], [0], [1], [0, 0, 1, 1], [], []>} : vector<16x16xbf16>, vector<16x72xbf16>, vector<16x72xf32> -> vector<16x72xf32>
    %20 = arith.addf %13, %19 : vector<16x72xf32>
    %21 = vector.extract_strided_slice %3 {offsets = [0, 1], sizes = [1, 72], strides = [1, 1]} : vector<1x82xf32> to vector<1x72xf32>
    %22 = arith.addf %15, %21 : vector<1x72xf32>
    %c6 = arith.constant 6 : index
    %c0_17 = arith.constant 0 : index
    %c0_18 = arith.constant 0 : index
    %23 = vector.load %arg3[%c6, %c0_17, %c0_18] : memref<9x16x16xbf16, #tpu.memory_space<vmem>>, vector<1x16x16xbf16>
    %24 = vector.shape_cast %23 : vector<1x16x16xbf16> to vector<16x16xbf16>
    %25 = vector.extract_strided_slice %8 {offsets = [0, 9], sizes = [16, 72], strides = [1, 1]} : vector<16x82xbf16> to vector<16x72xbf16>
    %cst_19 = arith.constant dense<0.000000e+00> : vector<16x72xf32>
    %26 = tpu.matmul %24, %25, %cst_19 {dimension_numbers = #tpu.dot_dimension_numbers<[1], [0], [0], [1], [0, 0, 1, 1], [], []>} : vector<16x16xbf16>, vector<16x72xbf16>, vector<16x72xf32> -> vector<16x72xf32>
    %27 = arith.addf %20, %26 : vector<16x72xf32>
    %28 = vector.extract_strided_slice %3 {offsets = [0, 9], sizes = [1, 72], strides = [1, 1]} : vector<1x82xf32> to vector<1x72xf32>
    %29 = arith.addf %22, %28 : vector<1x72xf32>
    %c8 = arith.constant 8 : index
    %c0_20 = arith.constant 0 : index
    %c0_21 = arith.constant 0 : index
    %30 = vector.load %arg3[%c8, %c0_20, %c0_21] : memref<9x16x16xbf16, #tpu.memory_space<vmem>>, vector<1x16x16xbf16>
    %31 = vector.shape_cast %30 : vector<1x16x16xbf16> to vector<16x16xbf16>
    %32 = vector.extract_strided_slice %8 {offsets = [0, 10], sizes = [16, 72], strides = [1, 1]} : vector<16x82xbf16> to vector<16x72xbf16>
    %cst_22 = arith.constant dense<0.000000e+00> : vector<16x72xf32>
    %33 = tpu.matmul %31, %32, %cst_22 {dimension_numbers = #tpu.dot_dimension_numbers<[1], [0], [0], [1], [0, 0, 1, 1], [], []>} : vector<16x16xbf16>, vector<16x72xbf16>, vector<16x72xf32> -> vector<16x72xf32>
    %34 = arith.addf %27, %33 : vector<16x72xf32>
    %35 = vector.extract_strided_slice %3 {offsets = [0, 10], sizes = [1, 72], strides = [1, 1]} : vector<1x82xf32> to vector<1x72xf32>
    %36 = arith.addf %29, %35 : vector<1x72xf32>
    %c0_23 = arith.constant 0 : index
    %c0_24 = arith.constant 0 : index
    %c1 = arith.constant 1 : index
    %c0_25 = arith.constant 0 : index
    %c0_26 = arith.constant 0 : index
    %37 = vector.load %arg2[%c0_23, %c0_24, %c1, %c0_25, %c0_26] : memref<1x2x2x1x82xf32, #tpu.memory_space<vmem>>, vector<1x1x1x1x82xf32>
    %38 = vector.shape_cast %37 : vector<1x1x1x1x82xf32> to vector<1x82xf32>
    %c0_27 = arith.constant 0 : index
    %c0_28 = arith.constant 0 : index
    %c1_29 = arith.constant 1 : index
    %c0_30 = arith.constant 0 : index
    %c0_31 = arith.constant 0 : index
    %39 = vector.load %arg1[%c0_27, %c0_28, %c1_29, %c0_30, %c0_31] : memref<1x2x2x16x82xbf16, #tpu.memory_space<vmem>>, vector<1x1x1x16x82xbf16>
    %40 = vector.shape_cast %39 : vector<1x1x1x16x82xbf16> to vector<16x82xbf16>
    %41 = arith.truncf %38 : vector<1x82xf32> to vector<1x82xbf16>
    %42 = vector.broadcast %41 : vector<1x82xbf16> to vector<16x82xbf16>
    %43 = arith.mulf %40, %42 : vector<16x82xbf16>
    %c1_32 = arith.constant 1 : index
    %c0_33 = arith.constant 0 : index
    %c0_34 = arith.constant 0 : index
    %44 = vector.load %arg3[%c1_32, %c0_33, %c0_34] : memref<9x16x16xbf16, #tpu.memory_space<vmem>>, vector<1x16x16xbf16>
    %45 = vector.shape_cast %44 : vector<1x16x16xbf16> to vector<16x16xbf16>
    %46 = vector.extract_strided_slice %43 {offsets = [0, 0], sizes = [16, 72], strides = [1, 1]} : vector<16x82xbf16> to vector<16x72xbf16>
    %cst_35 = arith.constant dense<0.000000e+00> : vector<16x72xf32>
    %47 = tpu.matmul %45, %46, %cst_35 {dimension_numbers = #tpu.dot_dimension_numbers<[1], [0], [0], [1], [0, 0, 1, 1], [], []>} : vector<16x16xbf16>, vector<16x72xbf16>, vector<16x72xf32> -> vector<16x72xf32>
    %48 = arith.addf %34, %47 : vector<16x72xf32>
    %49 = vector.extract_strided_slice %38 {offsets = [0, 0], sizes = [1, 72], strides = [1, 1]} : vector<1x82xf32> to vector<1x72xf32>
    %50 = arith.addf %36, %49 : vector<1x72xf32>
    %c7 = arith.constant 7 : index
    %c0_36 = arith.constant 0 : index
    %c0_37 = arith.constant 0 : index
    %51 = vector.load %arg3[%c7, %c0_36, %c0_37] : memref<9x16x16xbf16, #tpu.memory_space<vmem>>, vector<1x16x16xbf16>
    %52 = vector.shape_cast %51 : vector<1x16x16xbf16> to vector<16x16xbf16>
    %53 = vector.extract_strided_slice %43 {offsets = [0, 9], sizes = [16, 72], strides = [1, 1]} : vector<16x82xbf16> to vector<16x72xbf16>
    %cst_38 = arith.constant dense<0.000000e+00> : vector<16x72xf32>
    %54 = tpu.matmul %52, %53, %cst_38 {dimension_numbers = #tpu.dot_dimension_numbers<[1], [0], [0], [1], [0, 0, 1, 1], [], []>} : vector<16x16xbf16>, vector<16x72xbf16>, vector<16x72xf32> -> vector<16x72xf32>
    %55 = arith.addf %48, %54 : vector<16x72xf32>
    %56 = vector.extract_strided_slice %38 {offsets = [0, 9], sizes = [1, 72], strides = [1, 1]} : vector<1x82xf32> to vector<1x72xf32>
    %57 = arith.addf %50, %56 : vector<1x72xf32>
    %c0_39 = arith.constant 0 : index
    %c1_40 = arith.constant 1 : index
    %c0_41 = arith.constant 0 : index
    %c0_42 = arith.constant 0 : index
    %c0_43 = arith.constant 0 : index
    %58 = vector.load %arg2[%c0_39, %c1_40, %c0_41, %c0_42, %c0_43] : memref<1x2x2x1x82xf32, #tpu.memory_space<vmem>>, vector<1x1x1x1x82xf32>
    %59 = vector.shape_cast %58 : vector<1x1x1x1x82xf32> to vector<1x82xf32>
    %c0_44 = arith.constant 0 : index
    %c1_45 = arith.constant 1 : index
    %c0_46 = arith.constant 0 : index
    %c0_47 = arith.constant 0 : index
    %c0_48 = arith.constant 0 : index
    %60 = vector.load %arg1[%c0_44, %c1_45, %c0_46, %c0_47, %c0_48] : memref<1x2x2x16x82xbf16, #tpu.memory_space<vmem>>, vector<1x1x1x16x82xbf16>
    %61 = vector.shape_cast %60 : vector<1x1x1x16x82xbf16> to vector<16x82xbf16>
    %62 = arith.truncf %59 : vector<1x82xf32> to vector<1x82xbf16>
    %63 = vector.broadcast %62 : vector<1x82xbf16> to vector<16x82xbf16>
    %64 = arith.mulf %61, %63 : vector<16x82xbf16>
    %c3 = arith.constant 3 : index
    %c0_49 = arith.constant 0 : index
    %c0_50 = arith.constant 0 : index
    %65 = vector.load %arg3[%c3, %c0_49, %c0_50] : memref<9x16x16xbf16, #tpu.memory_space<vmem>>, vector<1x16x16xbf16>
    %66 = vector.shape_cast %65 : vector<1x16x16xbf16> to vector<16x16xbf16>
    %67 = vector.extract_strided_slice %64 {offsets = [0, 0], sizes = [16, 72], strides = [1, 1]} : vector<16x82xbf16> to vector<16x72xbf16>
    %cst_51 = arith.constant dense<0.000000e+00> : vector<16x72xf32>
    %68 = tpu.matmul %66, %67, %cst_51 {dimension_numbers = #tpu.dot_dimension_numbers<[1], [0], [0], [1], [0, 0, 1, 1], [], []>} : vector<16x16xbf16>, vector<16x72xbf16>, vector<16x72xf32> -> vector<16x72xf32>
    %69 = arith.addf %55, %68 : vector<16x72xf32>
    %70 = vector.extract_strided_slice %59 {offsets = [0, 0], sizes = [1, 72], strides = [1, 1]} : vector<1x82xf32> to vector<1x72xf32>
    %71 = arith.addf %57, %70 : vector<1x72xf32>
    %c5 = arith.constant 5 : index
    %c0_52 = arith.constant 0 : index
    %c0_53 = arith.constant 0 : index
    %72 = vector.load %arg3[%c5, %c0_52, %c0_53] : memref<9x16x16xbf16, #tpu.memory_space<vmem>>, vector<1x16x16xbf16>
    %73 = vector.shape_cast %72 : vector<1x16x16xbf16> to vector<16x16xbf16>
    %74 = vector.extract_strided_slice %64 {offsets = [0, 1], sizes = [16, 72], strides = [1, 1]} : vector<16x82xbf16> to vector<16x72xbf16>
    %cst_54 = arith.constant dense<0.000000e+00> : vector<16x72xf32>
    %75 = tpu.matmul %73, %74, %cst_54 {dimension_numbers = #tpu.dot_dimension_numbers<[1], [0], [0], [1], [0, 0, 1, 1], [], []>} : vector<16x16xbf16>, vector<16x72xbf16>, vector<16x72xf32> -> vector<16x72xf32>
    %76 = arith.addf %69, %75 : vector<16x72xf32>
    %77 = vector.extract_strided_slice %59 {offsets = [0, 1], sizes = [1, 72], strides = [1, 1]} : vector<1x82xf32> to vector<1x72xf32>
    %78 = arith.addf %71, %77 : vector<1x72xf32>
    %c0_55 = arith.constant 0 : index
    %c1_56 = arith.constant 1 : index
    %c1_57 = arith.constant 1 : index
    %c0_58 = arith.constant 0 : index
    %c0_59 = arith.constant 0 : index
    %79 = vector.load %arg2[%c0_55, %c1_56, %c1_57, %c0_58, %c0_59] : memref<1x2x2x1x82xf32, #tpu.memory_space<vmem>>, vector<1x1x1x1x82xf32>
    %80 = vector.shape_cast %79 : vector<1x1x1x1x82xf32> to vector<1x82xf32>
    %c0_60 = arith.constant 0 : index
    %c1_61 = arith.constant 1 : index
    %c1_62 = arith.constant 1 : index
    %c0_63 = arith.constant 0 : index
    %c0_64 = arith.constant 0 : index
    %81 = vector.load %arg1[%c0_60, %c1_61, %c1_62, %c0_63, %c0_64] : memref<1x2x2x16x82xbf16, #tpu.memory_space<vmem>>, vector<1x1x1x16x82xbf16>
    %82 = vector.shape_cast %81 : vector<1x1x1x16x82xbf16> to vector<16x82xbf16>
    %83 = arith.truncf %80 : vector<1x82xf32> to vector<1x82xbf16>
    %84 = vector.broadcast %83 : vector<1x82xbf16> to vector<16x82xbf16>
    %85 = arith.mulf %82, %84 : vector<16x82xbf16>
    %c4 = arith.constant 4 : index
    %c0_65 = arith.constant 0 : index
    %c0_66 = arith.constant 0 : index
    %86 = vector.load %arg3[%c4, %c0_65, %c0_66] : memref<9x16x16xbf16, #tpu.memory_space<vmem>>, vector<1x16x16xbf16>
    %87 = vector.shape_cast %86 : vector<1x16x16xbf16> to vector<16x16xbf16>
    %88 = vector.extract_strided_slice %85 {offsets = [0, 0], sizes = [16, 72], strides = [1, 1]} : vector<16x82xbf16> to vector<16x72xbf16>
    %cst_67 = arith.constant dense<0.000000e+00> : vector<16x72xf32>
    %89 = tpu.matmul %87, %88, %cst_67 {dimension_numbers = #tpu.dot_dimension_numbers<[1], [0], [0], [1], [0, 0, 1, 1], [], []>} : vector<16x16xbf16>, vector<16x72xbf16>, vector<16x72xf32> -> vector<16x72xf32>
    %90 = arith.addf %76, %89 : vector<16x72xf32>
    %91 = vector.extract_strided_slice %80 {offsets = [0, 0], sizes = [1, 72], strides = [1, 1]} : vector<1x82xf32> to vector<1x72xf32>
    %92 = arith.addf %78, %91 : vector<1x72xf32>
    %cst_68 = arith.constant 0.000000e+00 : f32
    %cst_69 = arith.constant 1.000000e+00 : f32
    %93 = vector.broadcast %cst_68 : f32 to vector<1x72xf32>
    %94 = arith.maximumf %93, %92 : vector<1x72xf32>
    %95 = vector.broadcast %cst_69 : f32 to vector<1x72xf32>
    %96 = arith.minimumf %95, %94 : vector<1x72xf32>
    %c0_70 = arith.constant 0 : index
    %c0_71 = arith.constant 0 : index
    %97 = vector.load %arg9[%c0_70, %c0_71] : memref<1x72xf32, #tpu.memory_space<vmem>>, vector<1x72xf32>
    %98 = arith.mulf %96, %97 : vector<1x72xf32>
    %cst_72 = arith.constant 9.99999993E-9 : f32
    %99 = vector.broadcast %cst_72 : f32 to vector<1x72xf32>
    %100 = arith.addf %92, %99 : vector<1x72xf32>
    %cst_73 = arith.constant 9.000000e+00 : f32
    %101 = vector.broadcast %cst_73 : f32 to vector<1x72xf32>
    %102 = arith.divf %101, %100 : vector<1x72xf32>
    %103 = arith.mulf %102, %98 : vector<1x72xf32>
    %104 = vector.broadcast %103 : vector<1x72xf32> to vector<16x72xf32>
    %105 = arith.mulf %90, %104 : vector<16x72xf32>
    %c0_74 = arith.constant 0 : index
    %c0_75 = arith.constant 0 : index
    %106 = vector.load %arg4[%c0_74, %c0_75] : memref<16x1xf32, #tpu.memory_space<vmem>>, vector<16x1xf32>
    %107 = vector.broadcast %106 : vector<16x1xf32> to vector<16x72xf32>
    %108 = arith.addf %105, %107 : vector<16x72xf32>
    %109 = vector.broadcast %98 : vector<1x72xf32> to vector<16x72xf32>
    %110 = arith.mulf %108, %109 : vector<16x72xf32>
    %cst_76 = arith.constant dense<0.000000e+00> : vector<16xf32>
    %111 = vector.multi_reduction <add>, %110, %cst_76 [1] : vector<16x72xf32> to vector<16xf32>
    %112 = vector.shape_cast %111 : vector<16xf32> to vector<16x1xf32>
    %113 = arith.mulf %110, %110 : vector<16x72xf32>
    %cst_77 = arith.constant dense<0.000000e+00> : vector<16xf32>
    %114 = vector.multi_reduction <add>, %113, %cst_77 [1] : vector<16x72xf32> to vector<16xf32>
    %115 = vector.shape_cast %114 : vector<16xf32> to vector<16x1xf32>
    %c0_78 = arith.constant 0 : index
    %c0_79 = arith.constant 0 : index
    %116 = vector.load %arg7[%c0_78, %c0_79] : memref<8x16xf32, #tpu.memory_space<vmem>>, vector<8x16xf32>
    %cst_80 = arith.constant dense<0.000000e+00> : vector<8x1xf32>
    %117 = tpu.matmul %116, %112, %cst_80 {dimension_numbers = #tpu.dot_dimension_numbers<[1], [0], [0], [1], [0, 0, 1, 1], [], []>} : vector<8x16xf32>, vector<16x1xf32>, vector<8x1xf32> -> vector<8x1xf32>
    %c0_81 = arith.constant 0 : index
    %c0_82 = arith.constant 0 : index
    %118 = vector.load %arg7[%c0_81, %c0_82] : memref<8x16xf32, #tpu.memory_space<vmem>>, vector<8x16xf32>
    %cst_83 = arith.constant dense<0.000000e+00> : vector<8x1xf32>
    %119 = tpu.matmul %118, %115, %cst_83 {dimension_numbers = #tpu.dot_dimension_numbers<[1], [0], [0], [1], [0, 0, 1, 1], [], []>} : vector<8x16xf32>, vector<16x1xf32>, vector<8x1xf32> -> vector<8x1xf32>
    %cst_84 = arith.constant 1.280000e+02 : f32
    %120 = vector.broadcast %cst_84 : f32 to vector<8x1xf32>
    %121 = arith.divf %117, %120 : vector<8x1xf32>
    %cst_85 = arith.constant 1.280000e+02 : f32
    %122 = vector.broadcast %cst_85 : f32 to vector<8x1xf32>
    %123 = arith.divf %119, %122 : vector<8x1xf32>
    %124 = arith.mulf %121, %121 : vector<8x1xf32>
    %125 = arith.subf %123, %124 : vector<8x1xf32>
    %cst_86 = arith.constant 0.000000e+00 : f32
    %126 = vector.broadcast %cst_86 : f32 to vector<8x1xf32>
    %127 = arith.maximumf %125, %126 : vector<8x1xf32>
    %cst_87 = arith.constant 9.99999974E-6 : f32
    %128 = vector.broadcast %cst_87 : f32 to vector<8x1xf32>
    %129 = arith.addf %127, %128 : vector<8x1xf32>
    %130 = math.rsqrt %129 : vector<8x1xf32>
    %c0_88 = arith.constant 0 : index
    %c0_89 = arith.constant 0 : index
    %131 = vector.load %arg8[%c0_88, %c0_89] : memref<16x8xf32, #tpu.memory_space<vmem>>, vector<16x8xf32>
    %cst_90 = arith.constant dense<0.000000e+00> : vector<16x1xf32>
    %132 = tpu.matmul %131, %121, %cst_90 {dimension_numbers = #tpu.dot_dimension_numbers<[1], [0], [0], [1], [0, 0, 1, 1], [], []>} : vector<16x8xf32>, vector<8x1xf32>, vector<16x1xf32> -> vector<16x1xf32>
    %c0_91 = arith.constant 0 : index
    %c0_92 = arith.constant 0 : index
    %133 = vector.load %arg8[%c0_91, %c0_92] : memref<16x8xf32, #tpu.memory_space<vmem>>, vector<16x8xf32>
    %cst_93 = arith.constant dense<0.000000e+00> : vector<16x1xf32>
    %134 = tpu.matmul %133, %130, %cst_93 {dimension_numbers = #tpu.dot_dimension_numbers<[1], [0], [0], [1], [0, 0, 1, 1], [], []>} : vector<16x8xf32>, vector<8x1xf32>, vector<16x1xf32> -> vector<16x1xf32>
    %c0_94 = arith.constant 0 : index
    %c0_95 = arith.constant 0 : index
    %135 = vector.load %arg5[%c0_94, %c0_95] : memref<16x1xf32, #tpu.memory_space<vmem>>, vector<16x1xf32>
    %136 = arith.mulf %135, %134 : vector<16x1xf32>
    %c0_96 = arith.constant 0 : index
    %c0_97 = arith.constant 0 : index
    %137 = vector.load %arg6[%c0_96, %c0_97] : memref<16x1xf32, #tpu.memory_space<vmem>>, vector<16x1xf32>
    %138 = arith.mulf %132, %136 : vector<16x1xf32>
    %139 = arith.subf %137, %138 : vector<16x1xf32>
    %140 = vector.broadcast %136 : vector<16x1xf32> to vector<16x72xf32>
    %141 = arith.mulf %110, %140 : vector<16x72xf32>
    %142 = vector.broadcast %139 : vector<16x1xf32> to vector<16x72xf32>
    %143 = arith.addf %141, %142 : vector<16x72xf32>
    %cst_98 = arith.constant 0.00999999977 : f32
    %144 = vector.broadcast %cst_98 : f32 to vector<16x72xf32>
    %145 = arith.mulf %144, %143 : vector<16x72xf32>
    %146 = arith.maximumf %143, %145 : vector<16x72xf32>
    %c0_99 = arith.constant 0 : index
    %c0_100 = arith.constant 0 : index
    %c0_101 = arith.constant 0 : index
    %147 = vector.load %arg10[%c0_99, %c0_100, %c0_101] : memref<1x16x72xf32, #tpu.memory_space<vmem>>, vector<1x16x72xf32>
    %148 = vector.shape_cast %147 : vector<1x16x72xf32> to vector<16x72xf32>
    %149 = vector.shape_cast %146 : vector<16x72xf32> to vector<1x16x72xf32>
    tpu.vector_store %arg10[%c0_99, %c0_100, %c0_101], %149 {strides = array<i32>} : memref<1x16x72xf32, #tpu.memory_space<vmem>>, vector<1x16x72xf32>,
    %c0_102 = arith.constant 0 : index
    %c0_103 = arith.constant 0 : index
    %c0_104 = arith.constant 0 : index
    %150 = vector.load %arg11[%c0_102, %c0_103, %c0_104] : memref<1x1x72xf32, #tpu.memory_space<vmem>>, vector<1x1x72xf32>
    %151 = vector.shape_cast %150 : vector<1x1x72xf32> to vector<1x72xf32>
    %152 = vector.shape_cast %98 : vector<1x72xf32> to vector<1x1x72xf32>
    tpu.vector_store %arg11[%c0_102, %c0_103, %c0_104], %152 {strides = array<i32>} : memref<1x1x72xf32, #tpu.memory_space<vmem>>, vector<1x1x72xf32>,
    return
  }
  func.func @transform_0(%arg0: i32) -> (i32, i32, i32, i32, i32) {
    %c0_i32 = arith.constant 0 : i32
    %c0_i32_0 = arith.constant 0 : i32
    %c0_i32_1 = arith.constant 0 : i32
    %c0_i32_2 = arith.constant 0 : i32
    %c0_i32_3 = arith.constant 0 : i32
    return %arg0, %c0_i32, %c0_i32_0, %c0_i32_1, %c0_i32_2 : i32, i32, i32, i32, i32
  }
  func.func @transform_1(%arg0: i32) -> (i32, i32, i32, i32, i32) {
    %c0_i32 = arith.constant 0 : i32
    %c0_i32_0 = arith.constant 0 : i32
    %c0_i32_1 = arith.constant 0 : i32
    %c0_i32_2 = arith.constant 0 : i32
    %c0_i32_3 = arith.constant 0 : i32
    return %arg0, %c0_i32, %c0_i32_0, %c0_i32_1, %c0_i32_2 : i32, i32, i32, i32, i32
  }
  func.func @transform_2(%arg0: i32) -> (i32, i32, i32) {
    %c0_i32 = arith.constant 0 : i32
    %c0_i32_0 = arith.constant 0 : i32
    %c0_i32_1 = arith.constant 0 : i32
    %c0_i32_2 = arith.constant 0 : i32
    return %c0_i32, %c0_i32_0, %c0_i32_1 : i32, i32, i32
  }
  func.func @transform_3(%arg0: i32) -> (i32, i32) {
    %c0_i32 = arith.constant 0 : i32
    %c0_i32_0 = arith.constant 0 : i32
    %c0_i32_1 = arith.constant 0 : i32
    return %c0_i32, %c0_i32_0 : i32, i32
  }
  func.func @transform_4(%arg0: i32) -> (i32, i32) {
    %c0_i32 = arith.constant 0 : i32
    %c0_i32_0 = arith.constant 0 : i32
    %c0_i32_1 = arith.constant 0 : i32
    return %c0_i32, %c0_i32_0 : i32, i32
  }
  func.func @transform_5(%arg0: i32) -> (i32, i32) {
    %c0_i32 = arith.constant 0 : i32
    %c0_i32_0 = arith.constant 0 : i32
    %c0_i32_1 = arith.constant 0 : i32
    return %c0_i32, %c0_i32_0 : i32, i32
  }
  func.func @transform_6(%arg0: i32) -> (i32, i32) {
    %c0_i32 = arith.constant 0 : i32
    %c0_i32_0 = arith.constant 0 : i32
    %c0_i32_1 = arith.constant 0 : i32
    return %c0_i32, %c0_i32_0 : i32, i32
  }
  func.func @transform_7(%arg0: i32) -> (i32, i32) {
    %c0_i32 = arith.constant 0 : i32
    %c0_i32_0 = arith.constant 0 : i32
    %c0_i32_1 = arith.constant 0 : i32
    return %c0_i32, %c0_i32_0 : i32, i32
  }
  func.func @transform_8(%arg0: i32) -> (i32, i32) {
    %c0_i32 = arith.constant 0 : i32
    %c0_i32_0 = arith.constant 0 : i32
    %c0_i32_1 = arith.constant 0 : i32
    return %c0_i32, %c0_i32_0 : i32, i32
  }
  func.func @transform_9(%arg0: i32) -> (i32, i32, i32) {
    %c0_i32 = arith.constant 0 : i32
    %c0_i32_0 = arith.constant 0 : i32
    %c0_i32_1 = arith.constant 0 : i32
    return %arg0, %c0_i32, %c0_i32_0 : i32, i32, i32
  }
  func.func @transform_10(%arg0: i32) -> (i32, i32, i32) {
    %c0_i32 = arith.constant 0 : i32
    %c0_i32_0 = arith.constant 0 : i32
    %c0_i32_1 = arith.constant 0 : i32
    return %arg0, %c0_i32, %c0_i32_0 : i32, i32, i32
  }
}

</mosaic_0001>

<bundles_post_ra>
// kernel: down_block_forward.2
= control target key start
LH: loop header
LB: loop body
LE: loop exit
PB: predicated region body
PF: predicated region fallthrough
CT: control target
= control target key end

     0   :  { %s2536_s13 = smov 0   ;;  %s2864_s0 = inlined_call_operand.vmem [shape: bf16[2,1,1,4,326], index: 0, kind: input, shape index: {}]   ;;  %s2865_s1 = inlined_call_operand.vmem [shape: f32[2,1,1,1,326], index: 1, kind: input, shape index: {}]   ;;  %s2866_s2 = inlined_call_operand.vmem [shape: bf16[9,16,4], index: 2, kind: input, shape index: {}]   ;;  %s2867_s3 = inlined_call_operand.vmem [shape: f32[16,1], index: 3, kind: input, shape index: {}]   ;;  %s2868_s4 = inlined_call_operand.vmem [shape: f32[16,1], index: 4, kind: input, shape index: {}]   ;;  %s2869_s5 = inlined_call_operand.vmem [shape: f32[16,1], index: 5, kind: input, shape index: {}]   ;;  %s2870_s6 = inlined_call_operand.vmem [shape: f32[8,16], index: 6, kind: input, shape index: {}]   ;;  %s2871_s7 = inlined_call_operand.vmem [shape: f32[16,8], index: 7, kind: input, shape index: {}]   ;;  %s2872_s8 = inlined_call_operand.vmem [shape: f32[1,288], index: 8, kind: input, shape index: {}]   ;;  %s2873_s9 = inlined_call_operand.vmem [shape: bf16[2,16,288], index: 9, kind: output, shape index: {0}]   ;;  %s2874_s10 = inlined_call_operand.vmem [shape: f32[2,1,288], index: 10, kind: output, shape index: {1}]  }
   0x1 LB: > { %s2168_s14 = sadd.s32 4294967295, %s2466_s13   ;;  %p2172_p0 = scmp.ge.s32.totalorder %s2466_s13, 1  ;;  %s2466_s13 = sphi %s2536_s13, %s21_s13  }
   0x2   : > { %p324_p1 = scmp.lt.s32.totalorder %s2466_s13, 3 }
   0x4   : > { %p325_p2 = pnand %p2172_p0, %p324_p1 }
   0x5   : > { %p370_p3 = scmp.lt.s32.totalorder (!%p325_p2), %s2168_s14, 1  ;;  %v392_v0 = vlaneseq (!%p325_p2)  ;;  %v2468_v5 = vmov (!%p325_p2), 1983009808   ;;  %v2469_v22 = vmov (!%p325_p2), 0.0   ;;  %vm2470_vm0 = vmmov (!%p325_p2), 0   ;;  %s2472_s23 = smov (!%p325_p2), 127  }
   0x6   : > { %328 = sbr.rel (%p325_p2) target bundleno = 1222 (0x4c6), region = 56  ;;  %v436_v6 = vunpack.c.l.s4 (!%p325_p2), %v2468_v5  ;;  %2273 = vmatprep.subr.bf16.mxu1 (!%p325_p2), %v2469_v22  ;;  %2275 = vmatprep.mubr.msk.bf16.mxu1 (!%p325_p2), %vm2470_vm0, %v2469_v22  ;;  %v2471_v28 = vmov (!%p325_p2), 0   ;;  %s2473_s24 = smov (!%p325_p2), 126   ;;  %v1607_v34 = vld [vmem:[%s2867_s3] sm:$0xff] (!%p325_p2)  ;;  %v1608_v35 = vld [vmem:[%s2867_s3 + $0x8] sm:$0xff] (!%p325_p2)  ;;  %vm493_vm1 = vcmask (!%p325_p2), 1041408  }
   0x7   : > { %v393_v1 = vshrl.u32 (!%p325_p2), %v392_v0, 7  ;;  %535 = vmatprep.mubr.bf16.mxu0 (!%p325_p2), %v2471_v28  ;;  %2445 = vset.pattern.permute.xlu0 (!%p325_p2), %v2471_v28  ;;  %s2474_s25 = smov (!%p325_p2), 110   ;;  %s2475_s26 = smov (!%p325_p2), 109   ;;  %vm486_vm2 = vcmask (!%p325_p2), 1039360   ;;  %v2447_v39 = vld [vmem:[%s2866_s2 + $0x8] sm:$0xff] (!%p325_p2)   ;;  %vm489_vm3 = vcmask (!%p325_p2), 31744  }
   0x8   : > { %v437_v11 = vunpack.c.0.s8 (!%p325_p2), %v436_v6  ;;  %2446 = vset.pattern.permute.xlu1 (!%p325_p2), %v2471_v28  ;;  %s2476_s27 = smov (!%p325_p2), 108   ;;  %s2477_s28 = smov (!%p325_p2), 92   ;;  %vm709_vm4 = vcmask (!%p325_p2), 1031168   ;;  %v2448_v52 = vld [vmem:[%s2866_s2] sm:$0xff] (!%p325_p2)   ;;  %vm835_vm5 = vcmask (!%p325_p2), 900096   ;;  %v2449_v63 = vld [vmem:[%s2866_s2 + $0x10] sm:$0xff] (!%p325_p2)  }
   0x9   : > { %v2547_v2 = vsub.s32 (!%p325_p2), 0, %v393_v1  ;;  %v2549_v3 = vsub.s32 (!%p325_p2), 1, %v393_v1  ;;  %v2552_v4 = vsub.s32 (!%p325_p2), 2, %v393_v1  ;;  %s2478_s29 = smov (!%p325_p2), 91   ;;  %s2479_s30 = smov (!%p325_p2), 90   ;;  %vm961_vm6 = vcmask (!%p325_p2), 891904  }
   0xa   : > { %v440_v18 = vsub.s32 (!%p325_p2), %v437_v11, %v393_v1  ;;  %vm1087_vm7 = vcmask (!%p325_p2), 883712   ;;  %vm1213_vm8 = vcmask (!%p325_p2), 752640   ;;  %vm1339_vm9 = vcmask (!%p325_p2), 744448  }
   0xb   : > { %vm1465_vm10 = vcmask (!%p325_p2), 736256   ;;  %vm2067_vm11 = vcmp.lt.s32.totalorder (!%p325_p2), %v392_v0, 288  ;;  %vm1648_vm12 = vcmask (!%p325_p2), 261120   ;;  %vm1675_vm13 = vcmask (!%p325_p2), 130048  }
   0xc   : > { %vm1829_vm14 = vcmask (!%p325_p2), 64512   ;;  %vm2061_vm15 = vcmask (!%p325_p2), 257024  }
   0xd   : > { %s2876_s14 = smov (!%p370_p3, %s2168_s14), 1 }
   0xe   : > { %s2422_s15 = smul.u32 3, %s2876_s14 }
   0xf   : > { %s2421_s19 = smul.u32 6, %s2876_s14 }
  0x10   : > { %s378_s18 = scalar_lea.vmem %s2865_s1, %s2422_s15  ;;  %s387_s17 = scalar_lea.vmem %s2874_s10, %s2422_s15 }
  0x11   : > { %v2559_v7 = vld [vmem:[%s378_s18] sm:$0x7]  ;;  %s374_s22 = scalar_lea.vmem %s2864_s0, %s2421_s19  ;;  %s2423_s15 = smul.u32 24, %s2876_s14 }
  0x12   : > { %v395_v8 = vrot.slane %v2559_v7, %v2547_v2  ;;  %v399_v9 = vrot.slane %v2559_v7, %v2549_v3  ;;  %v403_v10 = vrot.slane %v2559_v7, %v2552_v4  ;;  %v390_v26 = vld [vmem:[%s374_s22] sm:$0x3f] }
  0x13   : > { %s383_s22 = scalar_lea.vmem %s2873_s9, %s2423_s15 }
  0x14   : > { %v407_v12 = vpack.c.bf16 %v395_v8, %v395_v8  ;;  %v408_v13 = vpack.c.bf16 %v399_v9, %v399_v9  ;;  %v409_v14 = vpack.c.bf16 %v403_v10, %v403_v10 }
  0x16   : > { %v411_v15 = vpack.i.b16 %v407_v12, %v407_v12  ;;  %v418_v16 = vpack.i.b16 %v408_v13, %v408_v13  ;;  %v425_v17 = vpack.i.b16 %v409_v14, %v409_v14 }
  0x18   : > { %v416_v19 = vrot.slane %v411_v15, %v2547_v2  ;;  %v423_v20 = vrot.slane %v418_v16, %v2547_v2  ;;  %v430_v21 = vrot.slane %v425_v17, %v2547_v2  ;;  %v2450_v15 = vld [vmem:[%s2866_s2 + $0x18] sm:$0xff]  }
  0x1a   : > { %v434_v23 = vcombine.low %v416_v19, %v423_v20  ;;  %v448_v24 = vrot.slane %v430_v21, %v440_v18 }
  0x1c   : > { %v441_v25 = vrot.slane %v434_v23, %v440_v18 }
  0x1e   : > { %v449_v27 = vcombine.low %v441_v25, %v448_v24 }
  0x20   : > { %v451_v29 = vmul.bf16 %v449_v27, %v390_v26 }
  0x22   : > { %v2580_v30 = vrot.slane %v451_v29, %v440_v18  ;;  %v464_v31 = vcombine.high %v451_v29, %v451_v29  ;;  %v2451_v29 = vld [vmem:[%s2866_s2 + $0x20] sm:$0xff]  }
  0x24   : > { %480 = vrot.lane.b32.xlu0 %v2580_v30, %s2472_s23  ;;  %v478_v32 = vrot.slane %v464_v31, %v440_v18  ;;  %v479_v33 = vcombine.high %v2580_v30, %v2580_v30  ;;  %v596_v46 = vsel %vm493_vm1, %v2580_v30, 0 }
  0x26   : > { %484 = vrot.lane.b32.xlu1 %v478_v32, %s2472_s23  ;;  %v602_v43 = vsel %vm493_vm1, %v478_v32, 0 }
  0x28   : > { %482 = vrot.lane.b32.xlu0 %v479_v33, %s2472_s23 }
  0x2a   : > { %703 = vrot.lane.b32.xlu1 %v2580_v30, %s2473_s24 }
  0x2c   : > { %705 = vrot.lane.b32.xlu0 %v479_v33, %s2473_s24 }
  0x2e   : > { %707 = vrot.lane.b32.xlu1 %v478_v32, %s2473_s24 }
  0x30   : > { %829 = vrot.lane.b32.xlu0 %v2580_v30, %s2474_s25 }
  0x32   : > { %831 = vrot.lane.b32.xlu1 %v479_v33, %s2474_s25 }
  0x34   : > { %833 = vrot.lane.b32.xlu0 %v478_v32, %s2474_s25 }
  0x36   : > { %955 = vrot.lane.b32.xlu1 %v2580_v30, %s2475_s26 }
  0x38   : > { %957 = vrot.lane.b32.xlu0 %v479_v33, %s2475_s26 }
  0x3a   : > { %959 = vrot.lane.b32.xlu1 %v478_v32, %s2475_s26 }
  0x3c   : > { %1081 = vrot.lane.b32.xlu0 %v2580_v30, %s2476_s27 }
  0x3e   : > { %1083 = vrot.lane.b32.xlu1 %v479_v33, %s2476_s27 }
  0x40   : > { %1085 = vrot.lane.b32.xlu0 %v478_v32, %s2476_s27 }
  0x42   : > { %1207 = vrot.lane.b32.xlu1 %v2580_v30, %s2477_s28 }
  0x44   : > { %1209 = vrot.lane.b32.xlu0 %v479_v33, %s2477_s28 }
  0x46   : > { %1211 = vrot.lane.b32.xlu1 %v478_v32, %s2477_s28 }
  0x48   : > { %1333 = vrot.lane.b32.xlu0 %v2580_v30, %s2478_s29 }
  0x4a   : > { %1335 = vrot.lane.b32.xlu1 %v479_v33, %s2478_s29 }
  0x4c   : > { %1337 = vrot.lane.b32.xlu0 %v478_v32, %s2478_s29 }
  0x4e   : > { %1459 = vrot.lane.b32.xlu1 %v2580_v30, %s2479_s30 }
  0x50   : > { %1461 = vrot.lane.b32.xlu0 %v479_v33, %s2479_s30 }
  0x52   : > { %1463 = vrot.lane.b32.xlu1 %v478_v32, %s2479_s30 }
  0x54   : > { %688 = vrot.lane.b32.xlu0 %v2559_v7, %s2472_s23 }
  0x56   : > { %814 = vrot.lane.b32.xlu1 %v2559_v7, %s2473_s24 }
  0x58   : > { %940 = vrot.lane.b32.xlu0 %v2559_v7, %s2474_s25 }
  0x5a   : > { %1066 = vrot.lane.b32.xlu1 %v2559_v7, %s2475_s26 }
  0x5c   : > { %1192 = vrot.lane.b32.xlu0 %v2559_v7, %s2476_s27 }
  0x5e   : > { %1318 = vrot.lane.b32.xlu1 %v2559_v7, %s2477_s28 }
  0x60   : > { %1444 = vrot.lane.b32.xlu0 %v2559_v7, %s2478_s29 }
  0x62   : > { %1570 = vrot.lane.b32.xlu1 %v2559_v7, %s2479_s30 }
  0x64   : > { %1611 = vperm.xlu0 %2445, %v1607_v34  }
  0x66   : > { %1616 = vperm.xlu1 %2446, %v1608_v35  }
  0x96   : > { %v481_v36 = vpop.permute.xlu0 %480 }
  0x98   : > { %v485_v37 = vpop.permute.xlu1 %484 }
  0x99   : > { %v501_v38 = vsel %vm493_vm1, %v485_v37, 0 }
  0x9a   : > { %v483_v40 = vpop.permute.xlu0 %482  ;;  %2274 = vmatpush3.bf16.msra.mxu1 %v501_v38 }
  0x9b   : > { %v488_v41 = vsel %vm486_vm2, %v483_v40, %v485_v37  ;;  %v487_v42 = vsel %vm486_vm2, %v481_v36, %v483_v40  ;;  %2279 = vmatprep.subr.bf16.mxu1 %v2469_v22 }
  0x9c   : > { %2178 = vmatprep.subr.msk.bf16.mxu0 %vm493_vm1, %v488_v41  ;;  %v495_v44 = vsel %vm493_vm1, %v487_v42, 0  ;;  %v704_v45 = vpop.permute.xlu1 %703 }
  0x9d   : > { %504 = vmatpush1.bf16.msra.mxu0 %v495_v44  ;;  %2276 = vmatmul.mubr.msk.bf16.vlgmr.msra.gmra.mrb[0].mxu1 %vm489_vm3, %v2447_v39 }
  0x9e   : > { %2182 = vmatprep.subr.msk.bf16.mxu0 %vm493_vm1, %v479_v33  ;;  %2280 = vmatpush3.bf16.msra.mxu1 %v602_v43  ;;  %v706_v47 = vpop.permute.xlu0 %705 }
  0x9f   : > { %2281 = vmatprep.mubr.msk.bf16.mxu1 %vm2470_vm0, %v2469_v22  ;;  %2285 = vmatprep.subr.bf16.mxu1 %v2469_v22  ;;  %v710_v54 = vsel %vm709_vm4, %v704_v45, %v706_v47 }
  0xa0   : > { %2179 = vmatmul.mubr.msk.bf16.vlgmr.msra.gmra.mrb[0].mxu0 %vm489_vm3, %v2447_v39  ;;  %v708_v48 = vpop.permute.xlu1 %707  ;;  %v716_v57 = vsel %vm493_vm1, %v710_v54, 0 }
  0xa1   : > { %605 = vmatpush1.bf16.msra.mxu0 %v596_v46  ;;  %v711_v49 = vsel %vm709_vm4, %v706_v47, %v708_v48  ;;  %636 = vmatprep.mubr.bf16.mxu0 %v2471_v28  ;;  %v722_v55 = vsel %vm493_vm1, %v708_v48, 0 }
  0xa2   : > { %2188 = vmatprep.subr.msk.bf16.mxu0 %vm493_vm1, %v711_v49  ;;  %v830_v50 = vpop.permute.xlu0 %829 }
  0xa4   : > { %v832_v51 = vpop.permute.xlu1 %831 }
  0xa5   : > { %v836_v6 = vsel %vm835_vm5, %v830_v50, %v832_v51 }
  0xa6   : > { %v834_v53 = vpop.permute.xlu0 %833  ;;  %v842_v9 = vsel %vm493_vm1, %v836_v6, 0 }
  0xa7   : > { %v837_v59 = vsel %vm835_vm5, %v832_v51, %v834_v53  ;;  %v848_v5 = vsel %vm493_vm1, %v834_v53, 0 }
  0xa8   : > { %v956_v56 = vpop.permute.xlu1 %955 }
  0xa9   : > { %2282 = vmatmul.mubr.msk.bf16.vlgmr.msra.gmra.mrb[0].mxu1 %vm489_vm3, %v2448_v52 }
  0xaa   : > { %2286 = vmatpush3.bf16.msra.mxu1 %v722_v55  ;;  %2287 = vmatprep.mubr.msk.bf16.mxu1 %vm2470_vm0, %v2469_v22  ;;  %v958_v58 = vpop.permute.xlu0 %957 }
  0xab   : > { %2291 = vmatprep.subr.bf16.mxu1 %v2469_v22  ;;  %v962_v17 = vsel %vm961_vm6, %v956_v56, %v958_v58 }
  0xac   : > { %2183 = vmatmul.mubr.msk.bf16.vlgmr.msra.gmra.mrb[0].mxu0 %vm489_vm3, %v2448_v52  ;;  %v960_v60 = vpop.permute.xlu1 %959  ;;  %v968_v20 = vsel %vm493_vm1, %v962_v17, 0 }
  0xad   : > { %725 = vmatpush1.bf16.msra.mxu0 %v716_v57  ;;  %756 = vmatprep.mubr.bf16.mxu0 %v2471_v28  ;;  %v963_v11 = vsel %vm961_vm6, %v958_v58, %v960_v60  ;;  %v974_v18 = vsel %vm493_vm1, %v960_v60, 0  ;;  %v2452_v57 = vld [vmem:[%s2866_s2 + $0x28] sm:$0xff]  }
  0xae   : > { %2194 = vmatprep.subr.msk.bf16.mxu0 %vm493_vm1, %v837_v59  ;;  %v1082_v61 = vpop.permute.xlu0 %1081 }
  0xb0   : > { %v1084_v62 = vpop.permute.xlu1 %1083 }
  0xb1   : > { %v1088_v35 = vsel %vm1087_vm7, %v1082_v61, %v1084_v62 }
  0xb2   : > { %v1086_v1 = vpop.permute.xlu0 %1085  ;;  %v1094_v42 = vsel %vm493_vm1, %v1088_v35, 0 }
  0xb3   : > { %v1089_v23 = vsel %vm1087_vm7, %v1084_v62, %v1086_v1  ;;  %v1100_v34 = vsel %vm493_vm1, %v1086_v1, 0 }
  0xb4   : > { %v2650_v8 = vpop.permute.xlu1 %1207 }
  0xb5   : > { %2288 = vmatmul.mubr.msk.bf16.vlgmr.msra.gmra.mrb[0].mxu1 %vm489_vm3, %v2449_v63 }
  0xb6   : > { %2292 = vmatpush3.bf16.msra.mxu1 %v848_v5  ;;  %2293 = vmatprep.mubr.msk.bf16.mxu1 %vm2470_vm0, %v2469_v22  ;;  %v2656_v10 = vpop.permute.xlu0 %1209 }
  0xb7   : > { %2297 = vmatprep.subr.bf16.mxu1 %v2469_v22  ;;  %v1214_v61 = vsel %vm1213_vm8, %v2650_v8, %v2656_v10 }
  0xb8   : > { %2189 = vmatmul.mubr.msk.bf16.vlgmr.msra.gmra.mrb[0].mxu0 %vm489_vm3, %v2449_v63  ;;  %v2661_v12 = vpop.permute.xlu1 %1211  ;;  %v1220_v5 = vsel %vm493_vm1, %v1214_v61, 0 }
  0xb9   : > { %851 = vmatpush1.bf16.msra.mxu0 %v842_v9  ;;  %882 = vmatprep.mubr.bf16.mxu0 %v2471_v28  ;;  %v1215_v44 = vsel %vm1213_vm8, %v2656_v10, %v2661_v12  ;;  %v1226_v62 = vsel %vm493_vm1, %v2661_v12, 0  ;;  %v1579_v9 = vld [vmem:[%s2872_s8] sm:$0x7]  ;;  %v2453_v12 = vld [vmem:[%s2866_s2 + $0x30] sm:$0xff]  }
  0xba   : > { %2200 = vmatprep.subr.msk.bf16.mxu0 %vm493_vm1, %v963_v11  ;;  %v2665_v13 = vpop.permute.xlu0 %1333 }
  0xbc   : > { %v2667_v14 = vpop.permute.xlu1 %1335 }
  0xbd   : > { %v1340_v17 = vsel %vm1339_vm9, %v2665_v13, %v2667_v14  ;;  %v2454_v13 = vld [vmem:[%s2866_s2 + $0x38] sm:$0xff]  }
  0xbe   : > { %v2672_v16 = vpop.permute.xlu0 %1337 }
  0xbf   : > { %v1341_v8 = vsel %vm1339_vm9, %v2667_v14, %v2672_v16 }
  0xc0   : > { %v2676_v19 = vpop.permute.xlu1 %1459 }
  0xc1   : > { %2294 = vmatmul.mubr.msk.bf16.vlgmr.msra.gmra.mrb[0].mxu1 %vm489_vm3, %v2450_v15 }
  0xc2   : > { %2298 = vmatpush3.bf16.msra.mxu1 %v974_v18  ;;  %2299 = vmatprep.mubr.msk.bf16.mxu1 %vm2470_vm0, %v2469_v22  ;;  %v2682_v21 = vpop.permute.xlu0 %1461  ;;  %v1346_v18 = vsel %vm493_vm1, %v1340_v17, 0  ;;  %v2480_v17 = vmov 0.0|0.0  }
  0xc3   : > { %2303 = vmatprep.subr.bf16.mxu1 %v2469_v22  ;;  %v1466_v14 = vsel %vm1465_vm10, %v2676_v19, %v2682_v21  ;;  %v2455_v19 = vld [vmem:[%s2866_s2 + $0x40] sm:$0xff]  }
  0xc4   : > { %2195 = vmatmul.mubr.msk.bf16.vlgmr.msra.gmra.mrb[0].mxu0 %vm489_vm3, %v2450_v15  ;;  %v2687_v24 = vpop.permute.xlu1 %1463  ;;  %v1352_v15 = vsel %vm493_vm1, %v2672_v16, 0 }
  0xc5   : > { %977 = vmatpush1.bf16.msra.mxu0 %v968_v20  ;;  %1008 = vmatprep.mubr.bf16.mxu0 %v2471_v28  ;;  %v1467_v0 = vsel %vm1465_vm10, %v2682_v21, %v2687_v24  ;;  %v1478_v16 = vsel %vm493_vm1, %v2687_v24, 0  ;;  %v1472_v20 = vsel %vm493_vm1, %v1466_v14, 0  ;;  %v1674_v14 = vld [vmem:[%s2870_s6] sm:$0xff] }
  0xc6   : > { %2206 = vmatprep.subr.msk.bf16.mxu0 %vm493_vm1, %v1089_v23  ;;  %v689_v25 = vpop.permute.xlu0 %688 }
  0xc7   : > { %v690_v26 = vrot.slane %v689_v25, 1 }
  0xc8   : > { %v815_v27 = vpop.permute.xlu1 %814 }
  0xc9   : > { %v692_v30 = vsel %vm486_vm2, %v689_v25, %v690_v26  ;;  %v816_v31 = vrot.slane %v815_v27, 1 }
  0xca   : > { %v694_v32 = vadd.f32 %v692_v30, %v2559_v7  ;;  %v941_v33 = vpop.permute.xlu0 %940 }
  0xcb   : > { %v818_v36 = vsel %vm709_vm4, %v815_v27, %v816_v31  ;;  %v942_v37 = vrot.slane %v941_v33, 1 }
  0xcc   : > { %v820_v38 = vadd.f32 %v818_v36, %v694_v32  ;;  %v1067_v39 = vpop.permute.xlu1 %1066 }
  0xcd   : > { %2300 = vmatmul.mubr.msk.bf16.vlgmr.msra.gmra.mrb[0].mxu1 %vm489_vm3, %v2451_v29  ;;  %v944_v40 = vsel %vm835_vm5, %v941_v33, %v942_v37  ;;  %v1068_v41 = vrot.slane %v1067_v39, 1 }
  0xce   : > { %2304 = vmatpush3.bf16.msra.mxu1 %v1100_v34  ;;  %2305 = vmatprep.mubr.msk.bf16.mxu1 %vm2470_vm0, %v2469_v22  ;;  %v946_v7 = vadd.f32 %v944_v40, %v820_v38  ;;  %v1193_v43 = vpop.permute.xlu0 %1192 }
  0xcf   : > { %2309 = vmatprep.subr.bf16.mxu1 %v2469_v22  ;;  %v1070_v45 = vsel %vm961_vm6, %v1067_v39, %v1068_v41  ;;  %v1194_v46 = vrot.slane %v1193_v43, 1 }
  0xd0   : > { %2201 = vmatmul.mubr.msk.bf16.vlgmr.msra.gmra.mrb[0].mxu0 %vm489_vm3, %v2451_v29  ;;  %v1072_v47 = vadd.f32 %v1070_v45, %v946_v7  ;;  %v1319_v48 = vpop.permute.xlu1 %1318 }
  0xd1   : > { %1103 = vmatpush1.bf16.msra.mxu0 %v1094_v42  ;;  %1134 = vmatprep.mubr.bf16.mxu0 %v2471_v28  ;;  %v1196_v49 = vsel %vm1087_vm7, %v1193_v43, %v1194_v46  ;;  %v1320_v50 = vrot.slane %v1319_v48, 1 }
  0xd2   : > { %2212 = vmatprep.subr.msk.bf16.mxu0 %vm493_vm1, %v1215_v44  ;;  %v1198_v51 = vadd.f32 %v1196_v49, %v1072_v47  ;;  %v1445_v52 = vpop.permute.xlu0 %1444 }
  0xd3   : > { %v1322_v53 = vsel %vm1213_vm8, %v1319_v48, %v1320_v50  ;;  %v1446_v54 = vrot.slane %v1445_v52, 1 }
  0xd4   : > { %v1324_v55 = vadd.f32 %v1322_v53, %v1198_v51  ;;  %v1571_v56 = vpop.permute.xlu1 %1570 }
  0xd5   : > { %v1448_v58 = vsel %vm1339_vm9, %v1445_v52, %v1446_v54  ;;  %v1572_v59 = vrot.slane %v1571_v56, 1 }
  0xd6   : > { %v1450_v60 = vadd.f32 %v1448_v58, %v1324_v55 }
  0xd7   : > { %v1574_v63 = vsel %vm1465_vm10, %v1571_v56, %v1572_v59 }
  0xd8   : > { %v1576_v1 = vadd.f32 %v1574_v63, %v1450_v60 }
  0xd9   : > { %2306 = vmatmul.mubr.msk.bf16.vlgmr.msra.gmra.mrb[0].mxu1 %vm489_vm3, %v2452_v57 }
  0xda   : > { %2310 = vmatpush3.bf16.msra.mxu1 %v1226_v62  ;;  %2311 = vmatprep.mubr.msk.bf16.mxu1 %vm2470_vm0, %v2469_v22  ;;  %v1577_v6 = vmax.f32 %v1576_v1, 0.0  ;;  %v1581_v21 = vadd.f32 1e-08, %v1576_v1 }
  0xdb   : > { %2315 = vmatprep.subr.bf16.mxu1 %v2469_v22 }
  0xdc   : > { %2207 = vmatmul.mubr.msk.bf16.vlgmr.msra.gmra.mrb[0].mxu0 %vm489_vm3, %v2452_v57  ;;  %v1578_v10 = vmin.f32 %v1577_v6, 1.0  ;;  %2456 = vrcp.f32 %v1581_v21  ;;  %v1827_v21 = vld [vmem:[%s2871_s7] sm:$0xff] }
  0xdd   : > { %1229 = vmatpush1.bf16.msra.mxu0 %v1220_v5  ;;  %1260 = vmatprep.mubr.bf16.mxu0 %v2471_v28 }
  0xde   : > { %2218 = vmatprep.subr.msk.bf16.mxu0 %vm493_vm1, %v1341_v8  ;;  %v1580_v11 = vmul.f32 %v1579_v9, %v1578_v10 }
  0xe0   : > { %2069 = vst.msk [vmem:[%s387_s17] sm:$0x7] %vm2067_vm11, %v1580_v11  ;;  %v1637_v7 = vrot.slane %v1580_v11, %v2552_v4  ;;  %v1629_v44 = vrot.slane %v1580_v11, %v2547_v2  ;;  %v1633_v48 = vrot.slane %v1580_v11, %v2549_v3 }
  0xe3   : > { %v1612_v30 = vpop.permute.xlu0 %1611 }
  0xe5   : > { %2312 = vmatmul.mubr.msk.bf16.vlgmr.msra.gmra.mrb[0].mxu1 %vm489_vm3, %v2453_v12  ;;  %v1617_v33 = vpop.permute.xlu1 %1616 }
  0xe6   : > { %2316 = vmatpush3.bf16.msra.mxu1 %v1352_v15  ;;  %2317 = vmatprep.mubr.msk.bf16.mxu1 %vm2470_vm0, %v2469_v22  ;;  %v2457_v23 = vpop.eup %2456 }
  0xe7   : > { %2321 = vmatprep.subr.bf16.mxu1 %v2469_v22  ;;  %v1583_v24 = vmul.f32 9.0, %v2457_v23 }
  0xe8   : > { %2213 = vmatmul.mubr.msk.bf16.vlgmr.msra.gmra.mrb[0].mxu0 %vm489_vm3, %v2453_v12 }
  0xe9   : > { %1355 = vmatpush1.bf16.msra.mxu0 %v1346_v18  ;;  %1386 = vmatprep.mubr.bf16.mxu0 %v2471_v28  ;;  %v1584_v25 = vmul.f32 %v1583_v24, %v1580_v11 }
  0xea   : > { %2224 = vmatprep.subr.msk.bf16.mxu0 %vm493_vm1, %v1467_v0 }
  0xeb   : > { %v1589_v32 = vrot.slane %v1584_v25, %v2547_v2 }
  0xf1   : > { %2318 = vmatmul.mubr.msk.bf16.vlgmr.msra.gmra.mrb[0].mxu1 %vm489_vm3, %v2454_v13 }
  0xf2   : > { %2322 = vmatpush3.bf16.msra.mxu1 %v1478_v16  ;;  %2323 = vmatprep.mubr.msk.bf16.mxu1 %vm2470_vm0, %v2469_v22 }
  0xf3   : > { %2354 = vmatprep.subr.bf16.mxu1 %v2480_v17 }
  0xf4   : > { %2219 = vmatmul.mubr.msk.bf16.vlgmr.msra.gmra.mrb[0].mxu0 %vm489_vm3, %v2454_v13 }
  0xf5   : > { %1481 = vmatpush1.bf16.msra.mxu0 %v1472_v20  ;;  %1512 = vmatprep.mubr.bf16.mxu0 %v2471_v28  ;;  %v1597_v28 = vrot.slane %v1584_v25, %v2552_v4 }
  0xf6   : > { %2351 = vmatprep.subr.bf16.mxu0 %v2480_v17 }
  0xfd   : > { %2324 = vmatmul.mubr.msk.bf16.vlgmr.msra.gmra.mrb[0].mxu1 %vm489_vm3, %v2455_v19 }
  0xfe   : > { %2338 = vmatprep.mubr.msk.f32.mxu1 %vm2470_vm0, %v2469_v22 }
 0x100   : > { %2225 = vmatmul.mubr.msk.bf16.vlgmr.msra.gmra.mrb[0].mxu0 %vm489_vm3, %v2455_v19 }
 0x101   : > { %2331 = vmatprep.mubr.msk.f32.mxu0 %vm2470_vm0, %v2469_v22  ;;  %v1593_v22 = vrot.slane %v1584_v25, %v2549_v3 }
 0x1d0   : > { %v1557_v26 = vpop.f32.mrb[0].mxu1 }
 0x1d1   : > { %v1603_v27 = vmul.f32 %v1597_v28, %v1557_v26  ;;  %v2325_v29 = vpop.f32.mrb[1].mxu1 }
 0x1d2   : > { %v1560_v31 = vpop.f32.mrb[2].mxu1 }
 0x1d3   : > { %v1606_v34 = vmul.f32 %v1597_v28, %v1560_v31  ;;  %v1514_v35 = vpop.f32.mrb[0].mxu0  ;;  %v2326_v36 = vpop.f32.mrb[3].mxu1  ;;  %v1621_v37 = vadd.f32 %v1612_v30, %v1603_v27  ;;  %v1828_v28 = vld [vmem:[%s2871_s7 + $0x8] sm:$0xff] }
 0x1d4   : > { %v1601_v38 = vmul.f32 %v1589_v32, %v1514_v35  ;;  %v1516_v39 = vpop.f32.mrb[1].mxu0 }
 0x1d5   : > { %v1602_v40 = vmul.f32 %v1593_v22, %v1516_v39  ;;  %v1624_v41 = vadd.f32 %v1617_v33, %v1606_v34  ;;  %v1518_v42 = vpop.f32.mrb[2].mxu0  ;;  %v2792_v50 = vmul.f32 %v1637_v7, %v1621_v37  ;;  %v1986_v37 = vld [vmem:[%s2868_s4] sm:$0xff] }
 0x1d6   : > { %v1619_v43 = vadd.f32 %v1612_v30, %v1601_v38  ;;  %v1604_v45 = vmul.f32 %v1589_v32, %v1518_v42  ;;  %v1520_v46 = vpop.f32.mrb[3].mxu0  ;;  %v1991_v42 = vld [vmem:[%s2869_s5 + $0x8] sm:$0xff] }
 0x1d7   : > { %v1620_v47 = vadd.f32 %v1612_v30, %v1602_v40  ;;  %v1605_v49 = vmul.f32 %v1593_v22, %v1520_v46  ;;  %v2796_v52 = vmul.f32 %v1637_v7, %v1624_v41  ;;  %v1649_v58 = vsel %vm1648_vm12, %v2792_v50, 0.0  ;;  %v1987_v22 = vld [vmem:[%s2868_s4 + $0x8] sm:$0xff] }
 0x1d8   : > { %v2794_v51 = vmul.f32 %v1629_v44, %v1619_v43  ;;  %v1622_v53 = vadd.f32 %v1617_v33, %v1604_v45  ;;  %v1660_v5 = vmul.f32 %v2792_v50, %v2792_v50  ;;  %v1990_v43 = vld [vmem:[%s2869_s5] sm:$0xff] }
 0x1d9   : > { %v2798_v54 = vmul.f32 %v1633_v48, %v1620_v47  ;;  %v1623_v55 = vadd.f32 %v1617_v33, %v1605_v49  ;;  %v1663_v60 = vmul.f32 %v2796_v52, %v2796_v52  ;;  %v1654_v1 = vsel %vm1648_vm12, %v2796_v52, 0.0 }
 0x1da   : > { %v2800_v4 = vmul.f32 %v1629_v44, %v1622_v53  ;;  %v1658_v3 = vmul.f32 %v2794_v51, %v2794_v51  ;;  %v1665_v12 = vsel %vm1648_vm12, %v1660_v5, 0.0 }
 0x1db   : > { %v2802_v2 = vmul.f32 %v1633_v48, %v1623_v55  ;;  %v1647_v56 = vadd.f32 %v2798_v54, %v2794_v51  ;;  %v1659_v57 = vmul.f32 %v2798_v54, %v2798_v54  ;;  %v1670_v10 = vsel %vm1648_vm12, %v1663_v60, 0.0 }
 0x1dc   : > { %v1661_v59 = vmul.f32 %v2800_v4, %v2800_v4 }
 0x1dd   : > { %v1650_v61 = vadd.f32 %v1649_v58, %v1647_v56  ;;  %v1653_v62 = vadd.f32 %v2802_v2, %v2800_v4  ;;  %v1662_v63 = vmul.f32 %v2802_v2, %v2802_v2  ;;  %v1664_v9 = vadd.f32 %v1659_v57, %v1658_v3 }
 0x1df   : > { %1651 = vadd.xlane.f32.xlu1 %v1650_v61  ;;  %v1655_v6 = vadd.f32 %v1654_v1, %v1653_v62  ;;  %v1669_v8 = vadd.f32 %v1662_v63, %v1661_v59  ;;  %v1666_v15 = vadd.f32 %v1665_v12, %v1664_v9 }
 0x1e1   : > { %1656 = vadd.xlane.f32.xlu0 %v1655_v6  ;;  %v1671_v11 = vadd.f32 %v1670_v10, %v1669_v8 }
 0x1e3   : > { %1672 = vadd.xlane.f32.xlu1 %v1671_v11 }
 0x1e5   : > { %1667 = vadd.xlane.f32.xlu0 %v1666_v15 }
 0x26c   : > { %v1652_v18 = vpop.xlane.xlu1 %1651 }
 0x26e   : > { %v1657_v0 = vpop.xlane.xlu0 %1656 }
 0x26f   : > { %v2352_v13 = vpack.c.bf16 %v1657_v0, %v1652_v18 }
 0x270   : > { %v1673_v16 = vpop.xlane.xlu1 %1672 }
 0x271   : > { %2353 = vmatpush3.bf16.msra.mxu0 %v2352_v13 }
 0x272   : > { %v1668_v20 = vpop.xlane.xlu0 %1667 }
 0x273   : > { %v2355_v19 = vpack.c.bf16 %v1673_v16, %v1668_v20 }
 0x274   : > { %2332 = vmatmul.mubr.msk.f32.vlgmr.msra.gmra.mrb[4].mxu0 %vm1675_vm13, %v1674_v14 }
 0x275   : > { %2356 = vmatpush3.bf16.msra.mxu1 %v2355_v19  ;;  %2343 = vmatprep.mubr.msk.f32.mxu0 %vm1829_vm14, %v1827_v21 }
 0x278   : > { %2339 = vmatmul.mubr.msk.f32.vlgmr.msra.gmra.mrb[4].mxu1 %vm1675_vm13, %v1674_v14 }
 0x279   : > { %2348 = vmatprep.mubr.msk.f32.mxu1 %vm1829_vm14, %v1827_v21 }
 0x347   : > { %v1745_v23 = vpop.f32.mrb[4].mxu0 }
 0x348   : > { %v1820_v24 = vmul.f32 0.001953125, %v1745_v23  ;;  %v2333_v25 = vpop.f32.mrb[5].mxu0 }
 0x34a   : > { %v1822_v26 = vmul.f32 %v1820_v24, %v1820_v24  ;;  %2341 = vmatprep.subr.mxu0 %v1820_v24 }
 0x34b   : > { %v1815_v27 = vpop.f32.mrb[4].mxu1  ;;  %2342 = vmatpush3.msra.mxu0 %v1820_v24 }
 0x34c   : > { %v1821_v29 = vmul.f32 0.001953125, %v1815_v27  ;;  %v2340_v30 = vpop.f32.mrb[5].mxu1  ;;  %2344 = vmatmul.mubr.msk.f32.vlgmr.msra.gmra.mrb[6].mxu0 %vm1829_vm14, %v1828_v28 }
 0x34e   : > { %v1823_v31 = vsub.f32 %v1821_v29, %v1822_v26 }
 0x350   : > { %v1824_v32 = vmax.f32 %v1823_v31, 0.0 }
 0x352   : > { %v1825_v33 = vadd.f32 1e-05, %v1824_v32 }
 0x354   : > { %2458 = vrsqrt.f32 %v1825_v33 }
 0x35e   : > { %v2459_v34 = vpop.eup %2458 }
 0x35f   : > { %2346 = vmatprep.subr.mxu1 %v2459_v34 }
 0x360   : > { %2347 = vmatpush3.msra.mxu1 %v2459_v34 }
 0x361   : > { %2349 = vmatmul.mubr.msk.f32.vlgmr.msra.gmra.mrb[6].mxu1 %vm1829_vm14, %v1828_v28 }
 0x41f   : > { %v2345_v35 = vpop.f32.mrb[6].mxu0 }
 0x420   : > { %v1902_v36 = vpop.f32.mrb[7].mxu0 }
 0x434   : > { %v2350_v38 = vpop.f32.mrb[6].mxu1 }
 0x435   : > { %v1989_v39 = vmul.f32 %v2350_v38, %v1987_v22  ;;  %v1977_v40 = vpop.f32.mrb[7].mxu1 }
 0x436   : > { %v1988_v41 = vmul.f32 %v1986_v37, %v1977_v40 }
 0x437   : > { %v1993_v7 = vmul.f32 %v2345_v35, %v1989_v39  ;;  %2003 = vperm.xlu1 %2446, %v1989_v39  }
 0x438   : > { %v1992_v44 = vmul.f32 %v1988_v41, %v1902_v36  ;;  %1998 = vperm.xlu0 %2445, %v1988_v41  }
 0x439   : > { %v1995_v45 = vsub.f32 %v1991_v42, %v1993_v7 }
 0x43a   : > { %v1994_v46 = vsub.f32 %v1990_v43, %v1992_v44 }
 0x43c   : > { %2019 = vperm.xlu0 %2445, %v1995_v45   ;;  %2014 = vperm.xlu1 %2446, %v1994_v46  }
 0x4b6   : > { %v2004_v47 = vpop.permute.xlu1 %2003 }
 0x4b7   : > { %v1999_v48 = vpop.permute.xlu0 %1998  ;;  %v2009_v49 = vmul.f32 %v2004_v47, %v2800_v4  ;;  %v2010_v53 = vmul.f32 %v2004_v47, %v2802_v2  ;;  %v2011_v55 = vmul.f32 %v2004_v47, %v2796_v52 }
 0x4b8   : > { %v2006_v56 = vmul.f32 %v1999_v48, %v2794_v51  ;;  %v2007_v3 = vmul.f32 %v1999_v48, %v2798_v54  ;;  %v2008_v57 = vmul.f32 %v1999_v48, %v2792_v50 }
 0x4bb   : > { %v2020_v58 = vpop.permute.xlu0 %2019  ;;  %v2015_v59 = vpop.permute.xlu1 %2014 }
 0x4bc   : > { %v2025_v60 = vadd.f32 %v2020_v58, %v2009_v49  ;;  %v2026_v61 = vadd.f32 %v2020_v58, %v2010_v53  ;;  %v2027_v62 = vadd.f32 %v2020_v58, %v2011_v55  ;;  %v2022_v63 = vadd.f32 %v2015_v59, %v2006_v56 }
 0x4bd   : > { %v2023_v1 = vadd.f32 %v2015_v59, %v2007_v3  ;;  %v2024_v5 = vadd.f32 %v2015_v59, %v2008_v57 }
 0x4be   : > { %v2031_v4 = vmul.f32 0.01, %v2025_v60  ;;  %v2032_v6 = vmul.f32 0.01, %v2026_v61  ;;  %v2033_v2 = vmul.f32 0.01, %v2027_v62 }
 0x4bf   : > { %v2028_v8 = vmul.f32 0.01, %v2022_v63  ;;  %v2029_v52 = vmul.f32 0.01, %v2023_v1  ;;  %v2030_v9 = vmul.f32 0.01, %v2024_v5 }
 0x4c0   : > { %v2037_v51 = vmax.f32 %v2025_v60, %v2031_v4  ;;  %v2038_v10 = vmax.f32 %v2026_v61, %v2032_v6  ;;  %v2039_v54 = vmax.f32 %v2027_v62, %v2033_v2 }
 0x4c1   : > { %v2034_v50 = vmax.f32 %v2022_v63, %v2028_v8  ;;  %v2035_v11 = vmax.f32 %v2023_v1, %v2029_v52  ;;  %v2036_v12 = vmax.f32 %v2024_v5, %v2030_v9 }
 0x4c2   : > { %v2241_v15 = vpack.c.bf16 %v2038_v10, %v2037_v51  ;;  %v2242_v17 = vpack.c.bf16 %v2039_v54, %v2039_v54 }
 0x4c3   : > { %v2239_v18 = vpack.c.bf16 %v2035_v11, %v2034_v50  ;;  %v2240_v0 = vpack.c.bf16 %v2036_v12, %v2036_v12 }
 0x4c4   : > { %2063 = vst [vmem:[%s383_s22 + $0xc] sm:$0xff] %v2241_v15  ;;  %2064 = vst.msk [vmem:[%s383_s22 + $0x14] sm:$0xf] %vm2061_vm15, %v2242_v17 }
 0x4c5   : > { %2060 = vst [vmem:[%s383_s22] sm:$0xff] %v2239_v18  ;;  %2062 = vst.msk [vmem:[%s383_s22 + $0x8] sm:$0xf] %vm2061_vm15, %v2240_v0 }
 0x4c6 PF: > { %s21_s13 = sadd.s32 1, %s2466_s13  }
 0x4c7   : > { %p18_p4 = scmp.ge.s32.totalorder %s21_s13, 4  }
 0x4c9   :  { %20 = sbr.rel (!%p18_p4) target bundleno = 1 (0x1), region = 109 }

// kernel: down_block_forward.3
= control target key start
LH: loop header
LB: loop body
LE: loop exit
PB: predicated region body
PF: predicated region fallthrough
CT: control target
= control target key end

     0   :  { %s1822_s13 = smov 0   ;;  %s2023_s0 = inlined_call_operand.vmem [shape: bf16[2,2,2,16,82], index: 0, kind: input, shape index: {}]   ;;  %s2024_s1 = inlined_call_operand.vmem [shape: f32[2,2,2,1,82], index: 1, kind: input, shape index: {}]   ;;  %s2025_s2 = inlined_call_operand.vmem [shape: bf16[9,16,16], index: 2, kind: input, shape index: {}]   ;;  %s2026_s3 = inlined_call_operand.vmem [shape: f32[16,1], index: 3, kind: input, shape index: {}]   ;;  %s2027_s4 = inlined_call_operand.vmem [shape: f32[16,1], index: 4, kind: input, shape index: {}]   ;;  %s2028_s5 = inlined_call_operand.vmem [shape: f32[16,1], index: 5, kind: input, shape index: {}]   ;;  %s2029_s6 = inlined_call_operand.vmem [shape: f32[8,16], index: 6, kind: input, shape index: {}]   ;;  %s2030_s7 = inlined_call_operand.vmem [shape: f32[16,8], index: 7, kind: input, shape index: {}]   ;;  %s2031_s8 = inlined_call_operand.vmem [shape: f32[1,72], index: 8, kind: input, shape index: {}]   ;;  %s2032_s9 = inlined_call_operand.vmem [shape: f32[2,16,72], index: 9, kind: output, shape index: {0}]   ;;  %s2033_s10 = inlined_call_operand.vmem [shape: f32[2,1,72], index: 10, kind: output, shape index: {1}]  }
   0x1 LB: > { %s1507_s14 = sadd.s32 4294967295, %s1758_s13   ;;  %p1511_p0 = scmp.ge.s32.totalorder %s1758_s13, 1  ;;  %s1758_s13 = sphi %s1822_s13, %s21_s13  }
   0x2   : > { %p324_p1 = scmp.lt.s32.totalorder %s1758_s13, 3 }
   0x4   : > { %p325_p2 = pnand %p1511_p0, %p324_p1 }
   0x5   : > { %p369_p3 = scmp.lt.s32.totalorder (!%p325_p2), %s1507_s14, 1  ;;  %v394_v0 = vlaneseq (!%p325_p2)  ;;  %v1760_v1 = vmov (!%p325_p2), 0.0   ;;  %vm1761_vm0 = vmmov (!%p325_p2), 0   ;;  %s1762_s23 = smov (!%p325_p2), 118   ;;  %v1025_v44 = vld [vmem:[%s2026_s3] sm:$0xff] (!%p325_p2)  ;;  %v1026_v45 = vld [vmem:[%s2026_s3 + $0x8] sm:$0xff] (!%p325_p2) }
   0x6   : > { %328 = sbr.rel (%p325_p2) target bundleno = 1168 (0x490), region = 56  ;;  %1626 = vmatprep.subr.bf16.mxu0 (!%p325_p2), %v1760_v1  ;;  %1608 = vmatprep.subr.bf16.mxu1 (!%p325_p2), %v1760_v1  ;;  %s1763_s24 = smov (!%p325_p2), 127   ;;  %v1765_v46 = vmov (!%p325_p2), 0   ;;  %v1739_v48 = vld [vmem:[%s2025_s2 + $0x40] sm:$0xff] (!%p325_p2)   ;;  %v1740_v50 = vld [vmem:[%s2025_s2 + $0x10] sm:$0xff] (!%p325_p2)   ;;  %vm423_vm1 = vcmask (!%p325_p2), 130048  }
   0x7   : > { %v395_v2 = vshrl.u32 (!%p325_p2), %v394_v0, 7  ;;  %1628 = vmatprep.mubr.msk.bf16.mxu0 (!%p325_p2), %vm1761_vm0, %v1760_v1  ;;  %1610 = vmatprep.mubr.msk.bf16.mxu1 (!%p325_p2), %vm1761_vm0, %v1760_v1  ;;  %s1764_s25 = smov (!%p325_p2), 119   ;;  %v1741_v56 = vld [vmem:[%s2025_s2 + $0x8] sm:$0xff] (!%p325_p2)   ;;  %v1742_v57 = vld [vmem:[%s2025_s2] sm:$0xff] (!%p325_p2)   ;;  %vm1413_vm2 = vcmask (!%p325_p2), 581632   ;;  %vm1047_vm3 = vcmask (!%p325_p2), 588800  }
   0x8   : > { %1737 = vset.pattern.permute.xlu0 (!%p325_p2), %v1765_v46  ;;  %1738 = vset.pattern.permute.xlu1 (!%p325_p2), %v1765_v46  ;;  %vm1216_vm4 = vcmask (!%p325_p2), 64512  }
   0x9   : > { %v1846_v5 = vsub.s32 (!%p325_p2), 0, %v395_v2 }
   0xd   : > { %s2035_s14 = smov (!%p369_p3, %s1507_s14), 1 }
   0xe   : > { %s1514_s15 = sshll.u32 %s2035_s14, 2  ;;  %s1576_s19 = sshll.u32 %s2035_s14, 5 }
   0xf   : > { %s1838_s18 = scalar_lea.vmem %s2024_s1, %s1514_s15  ;;  %s1859_s22 = scalar_lea.vmem %s2023_s0, %s1576_s19 }
  0x10   : > { %v1842_v3 = vld [vmem:[%s1838_s18] sm:$0x1]  ;;  %v1849_v6 = vld [vmem:[%s1838_s18 + $0x1] sm:$0x1]  ;;  %v1854_v8 = vld [vmem:[%s1838_s18 + $0x2] sm:$0x1]  ;;  %s385_s28 = scalar_lea.vmem %s2033_s10, %s2035_s14 }
  0x11   : > { %v390_v4 = vpack.c.bf16 %v1842_v3, %v1842_v3  ;;  %v650_v7 = vpack.c.bf16 %v1849_v6, %v1849_v6  ;;  %v792_v10 = vpack.c.bf16 %v1854_v8, %v1854_v8  ;;  %v388_v14 = vld [vmem:[%s1859_s22] sm:$0xf]  ;;  %v389_v15 = vld [vmem:[%s1859_s22 + $0x4] sm:$0xf]  ;;  %v1534_v18 = vld [vmem:[%s1859_s22 + $0x8] sm:$0xf] }
  0x12   : > { %v1535_v19 = vld [vmem:[%s1859_s22 + $0xc] sm:$0xf]  ;;  %v1547_v22 = vld [vmem:[%s1859_s22 + $0x10] sm:$0xf]  ;;  %v1548_v23 = vld [vmem:[%s1859_s22 + $0x14] sm:$0xf] }
  0x13   : > { %v392_v9 = vpack.i.b16 %v390_v4, %v390_v4  ;;  %v652_v11 = vpack.i.b16 %v650_v7, %v650_v7  ;;  %v794_v13 = vpack.i.b16 %v792_v10, %v792_v10  ;;  %v1559_v34 = vld [vmem:[%s1838_s18 + $0x3] sm:$0x1]  ;;  %v1560_v38 = vld [vmem:[%s1859_s22 + $0x18] sm:$0xf]  ;;  %v1561_v39 = vld [vmem:[%s1859_s22 + $0x1c] sm:$0xf] }
  0x14   : > { %v934_v35 = vpack.c.bf16 %v1559_v34, %v1559_v34  ;;  %v1743_v7 = vld [vmem:[%s2025_s2 + $0x38] sm:$0xff]   ;;  %s1577_s11 = sshll.u32 %s2035_s14, 4 }
  0x15   : > { %v397_v12 = vrot.slane %v392_v9, %v1846_v5  ;;  %v657_v16 = vrot.slane %v652_v11, %v1846_v5  ;;  %v799_v20 = vrot.slane %v794_v13, %v1846_v5  ;;  %v1011_v11 = vld [vmem:[%s2031_s8] sm:$0x1]  ;;  %v1745_v13 = vld [vmem:[%s2025_s2 + $0x18] sm:$0xff]   ;;  %s382_s16 = scalar_lea.vmem %s2032_s9, %s1577_s11 }
  0x16   : > { %v936_v36 = vpack.i.b16 %v934_v35, %v934_v35 }
  0x17   : > { %v1517_v17 = vcombine.low %v397_v12, %v397_v12  ;;  %v1536_v21 = vcombine.low %v657_v16, %v657_v16  ;;  %v1549_v26 = vcombine.low %v799_v20, %v799_v20 }
  0x18   : > { %v941_v37 = vrot.slane %v936_v36, %v1846_v5 }
  0x19   : > { %v402_v24 = vmul.bf16 %v1517_v17, %v388_v14  ;;  %v403_v25 = vmul.bf16 %v1517_v17, %v389_v15  ;;  %v662_v27 = vmul.bf16 %v1536_v21, %v1534_v18  ;;  %v663_v28 = vmul.bf16 %v1536_v21, %v1535_v19  ;;  %v1746_v14 = vld [vmem:[%s2025_s2 + $0x28] sm:$0xff]   ;;  %v1747_v15 = vld [vmem:[%s2025_s2 + $0x20] sm:$0xff]  }
  0x1a   : > { %v804_v30 = vmul.bf16 %v1549_v26, %v1547_v22  ;;  %v805_v31 = vmul.bf16 %v1549_v26, %v1548_v23  ;;  %v1562_v40 = vcombine.low %v941_v37, %v941_v37 }
  0x1b   : > { %v1521_v29 = vcombine.low %v402_v24, %v403_v25  ;;  %v1540_v32 = vcombine.low %v662_v27, %v663_v28 }
  0x1c   : > { %v1876_v33 = vcombine.low %v804_v30, %v805_v31  ;;  %v946_v41 = vmul.bf16 %v1562_v40, %v1560_v38  ;;  %v947_v42 = vmul.bf16 %v1562_v40, %v1561_v39 }
  0x1d   : > { %592 = vrot.lane.b32.xlu0 %v1521_v29, %s1762_s23  ;;  %420 = vrot.lane.b32.xlu1 %v1521_v29, %s1763_s24 }
  0x1e   : > { %v1888_v43 = vcombine.low %v946_v41, %v947_v42 }
  0x21   : > { %733 = vrot.lane.b32.xlu0 %v1540_v32, %s1764_s25  ;;  %875 = vrot.lane.b32.xlu1 %v1876_v33, %s1763_s24 }
  0x25   : > { %531 = vrot.lane.b32.xlu0 %v1521_v29, %s1764_s25  ;;  %519 = vrot.lane.b32.xlu1 %v1842_v3, %s1763_s24 }
  0x29   : > { %580 = vrot.lane.b32.xlu0 %v1842_v3, %s1764_s25  ;;  %641 = vrot.lane.b32.xlu1 %v1842_v3, %s1762_s23 }
  0x2d   : > { %783 = vrot.lane.b32.xlu0 %v1849_v6, %s1764_s25  ;;  %925 = vrot.lane.b32.xlu1 %v1854_v8, %s1763_s24 }
  0x31   : > { %1029 = vperm.xlu0 %1737, %v1025_v44   ;;  %1034 = vperm.xlu1 %1738, %v1026_v45   ;;  %v1766_v45 = vmov 0.0|0.0  }
  0x8f   : > { %v593_v47 = vpop.permute.xlu0 %592  ;;  %v421_v49 = vpop.permute.xlu1 %420 }
  0x90   : > { %1627 = vmatpush3.bf16.msra.mxu0 %v593_v47  ;;  %1609 = vmatpush3.bf16.msra.mxu1 %v421_v49  ;;  %v1062_v49 = vld [vmem:[%s2029_s6] sm:$0xff] }
  0x91   : > { %1632 = vmatprep.subr.bf16.mxu0 %v1760_v1  ;;  %1614 = vmatprep.subr.bf16.mxu1 %v1760_v1 }
  0x93   : > { %1629 = vmatmul.mubr.msk.bf16.vlgmr.msra.gmra.mrb[0].mxu0 %vm423_vm1, %v1739_v48  ;;  %1611 = vmatmul.mubr.msk.bf16.vlgmr.msra.gmra.mrb[0].mxu1 %vm423_vm1, %v1740_v50  ;;  %v734_v51 = vpop.permute.xlu0 %733  ;;  %v876_v52 = vpop.permute.xlu1 %875 }
  0x94   : > { %1633 = vmatpush3.bf16.msra.mxu0 %v1540_v32  ;;  %1634 = vmatprep.mubr.msk.bf16.mxu0 %vm1761_vm0, %v1760_v1 }
  0x95   : > { %1638 = vmatprep.subr.bf16.mxu0 %v1760_v1  ;;  %1615 = vmatpush3.bf16.msra.mxu1 %v1521_v29 }
  0x96   : > { %1616 = vmatprep.mubr.msk.bf16.mxu1 %vm1761_vm0, %v1760_v1  ;;  %1620 = vmatprep.subr.bf16.mxu1 %v1760_v1 }
  0x97   : > { %v532_v53 = vpop.permute.xlu0 %531  ;;  %v520_v54 = vpop.permute.xlu1 %519 }
  0x98   : > { %v522_v55 = vadd.f32 %v520_v54, %v1842_v3 }
  0x9b   : > { %v581_v58 = vpop.permute.xlu0 %580  ;;  %v642_v59 = vpop.permute.xlu1 %641 }
  0x9c   : > { %v583_v60 = vadd.f32 %v581_v58, %v522_v55 }
  0x9e   : > { %v644_v61 = vadd.f32 %v642_v59, %v583_v60 }
  0x9f   : > { %1635 = vmatmul.mubr.msk.bf16.vlgmr.msra.gmra.mrb[0].mxu0 %vm423_vm1, %v1741_v56  ;;  %1617 = vmatmul.mubr.msk.bf16.vlgmr.msra.gmra.mrb[0].mxu1 %vm423_vm1, %v1742_v57  ;;  %v784_v62 = vpop.permute.xlu0 %783  ;;  %v926_v2 = vpop.permute.xlu1 %925  ;;  %v1215_v57 = vld [vmem:[%s2030_s7 + $0x8] sm:$0xff] }
  0xa0   : > { %1639 = vmatpush3.bf16.msra.mxu0 %v734_v51  ;;  %1640 = vmatprep.mubr.msk.bf16.mxu0 %vm1761_vm0, %v1760_v1  ;;  %v724_v63 = vadd.f32 %v1849_v6, %v644_v61  ;;  %v1744_v6 = vld [vmem:[%s2025_s2 + $0x30] sm:$0xff]  }
  0xa1   : > { %1644 = vmatprep.subr.bf16.mxu0 %v1760_v1  ;;  %1621 = vmatpush3.bf16.msra.mxu1 %v532_v53  ;;  %v1214_v53 = vld [vmem:[%s2030_s7] sm:$0xff] }
  0xa2   : > { %1622 = vmatprep.mubr.msk.bf16.mxu1 %vm1761_vm0, %v1760_v1  ;;  %v786_v0 = vadd.f32 %v784_v62, %v724_v63  ;;  %1686 = vmatprep.subr.bf16.mxu1 %v1766_v45 }
  0xa4   : > { %v866_v3 = vadd.f32 %v1854_v8, %v786_v0 }
  0xa6   : > { %v928_v4 = vadd.f32 %v926_v2, %v866_v3 }
  0xa8   : > { %v1008_v9 = vadd.f32 %v1559_v34, %v928_v4  ;;  %v1374_v4 = vld [vmem:[%s2027_s4 + $0x8] sm:$0xff] }
  0xaa   : > { %v1009_v10 = vmax.f32 %v1008_v9, 0.0  ;;  %v1013_v20 = vadd.f32 1e-08, %v1008_v9 }
  0xab   : > { %1641 = vmatmul.mubr.msk.bf16.vlgmr.msra.gmra.mrb[0].mxu0 %vm423_vm1, %v1743_v7  ;;  %1623 = vmatmul.mubr.msk.bf16.vlgmr.msra.gmra.mrb[0].mxu1 %vm423_vm1, %v1744_v6  ;;  %v1373_v7 = vld [vmem:[%s2027_s4] sm:$0xff] }
  0xac   : > { %1645 = vmatpush3.bf16.msra.mxu0 %v1876_v33  ;;  %1646 = vmatprep.mubr.msk.bf16.mxu0 %vm1761_vm0, %v1760_v1  ;;  %v1010_v8 = vmin.f32 %v1009_v10, 1.0  ;;  %1748 = vrcp.f32 %v1013_v20 }
  0xad   : > { %1650 = vmatprep.subr.bf16.mxu0 %v1760_v1  ;;  %1666 = vmatprep.mubr.msk.f32.mxu1 %vm1761_vm0, %v1760_v1 }
  0xae   : > { %v1012_v12 = vmul.f32 %v1011_v11, %v1010_v8  ;;  %v1378_v8 = vld [vmem:[%s2028_s5 + $0x8] sm:$0xff] }
  0xb0   : > { %1414 = vst.msk [vmem:[%s385_s28] sm:$0x1] %vm1413_vm2, %v1012_v12  ;;  %v1030_v29 = vpop.permute.xlu0 %1029  ;;  %v1035_v33 = vpop.permute.xlu1 %1034  ;;  %v1043_v34 = vrot.slane %v1012_v12, %v1846_v5 }
  0xb6   : > { %v1749_v21 = vpop.eup %1748 }
  0xb7   : > { %1647 = vmatmul.mubr.msk.bf16.vlgmr.msra.gmra.mrb[0].mxu0 %vm423_vm1, %v1745_v13  ;;  %v1015_v22 = vmul.f32 9.0, %v1749_v21  ;;  %v1377_v13 = vld [vmem:[%s2028_s5] sm:$0xff] }
  0xb8   : > { %1651 = vmatpush3.bf16.msra.mxu0 %v876_v52  ;;  %1652 = vmatprep.mubr.msk.bf16.mxu0 %vm1761_vm0, %v1760_v1 }
  0xb9   : > { %1656 = vmatprep.subr.bf16.mxu0 %v1760_v1  ;;  %v1016_v23 = vmul.f32 %v1015_v22, %v1012_v12 }
  0xbb   : > { %v1021_v27 = vrot.slane %v1016_v23, %v1846_v5 }
  0xc3   : > { %1653 = vmatmul.mubr.msk.bf16.vlgmr.msra.gmra.mrb[0].mxu0 %vm423_vm1, %v1746_v14 }
  0xc4   : > { %1657 = vmatpush3.bf16.msra.mxu0 %v1888_v43  ;;  %1658 = vmatprep.mubr.msk.bf16.mxu0 %vm1761_vm0, %v1760_v1 }
  0xcf   : > { %1659 = vmatmul.mubr.msk.bf16.vlgmr.msra.gmra.mrb[0].mxu0 %vm423_vm1, %v1747_v15 }
 0x17e   : > { %v571_v16 = vpop.f32.mrb[0].mxu1 }
 0x17f   : > { %v1624_v17 = vpop.f32.mrb[1].mxu1 }
 0x180   : > { %v574_v18 = vpop.f32.mrb[2].mxu1 }
 0x181   : > { %v1625_v19 = vpop.f32.mrb[3].mxu1 }
 0x1a2   : > { %v999_v24 = vpop.f32.mrb[0].mxu0 }
 0x1a3   : > { %v1692_v25 = vadd.f32 %v999_v24, %v571_v16  ;;  %v1660_v26 = vpop.f32.mrb[1].mxu0 }
 0x1a4   : > { %v1002_v28 = vpop.f32.mrb[2].mxu0 }
 0x1a5   : > { %v1693_v30 = vadd.f32 %v1002_v28, %v574_v18  ;;  %v1661_v31 = vpop.f32.mrb[3].mxu0  ;;  %v1023_v32 = vmul.f32 %v1692_v25, %v1021_v27 }
 0x1a7   : > { %v1037_v35 = vadd.f32 %v1030_v29, %v1023_v32  ;;  %v1024_v36 = vmul.f32 %v1693_v30, %v1021_v27 }
 0x1a9   : > { %v1969_v37 = vmul.f32 %v1043_v34, %v1037_v35  ;;  %v1038_v38 = vadd.f32 %v1035_v33, %v1024_v36 }
 0x1ab   : > { %v1971_v39 = vmul.f32 %v1043_v34, %v1038_v38  ;;  %v1048_v40 = vsel %vm1047_vm3, %v1969_v37, 0.0  ;;  %v1054_v5 = vmul.f32 %v1969_v37, %v1969_v37 }
 0x1ac   : > { %1049 = vadd.xlane.f32.xlu1 %v1048_v40 }
 0x1ad   : > { %v1051_v41 = vsel %vm1047_vm3, %v1971_v39, 0.0  ;;  %v1055_v42 = vmul.f32 %v1971_v39, %v1971_v39  ;;  %v1056_v44 = vsel %vm1047_vm3, %v1054_v5, 0.0 }
 0x1ae   : > { %1052 = vadd.xlane.f32.xlu0 %v1051_v41 }
 0x1af   : > { %v1059_v43 = vsel %vm1047_vm3, %v1055_v42, 0.0 }
 0x1b0   : > { %1060 = vadd.xlane.f32.xlu1 %v1059_v43 }
 0x1b2   : > { %1057 = vadd.xlane.f32.xlu0 %v1056_v44 }
 0x239   : > { %v1050_v46 = vpop.xlane.xlu1 %1049 }
 0x23b   : > { %v1053_v47 = vpop.xlane.xlu0 %1052 }
 0x23c   : > { %v1687_v48 = vpack.c.bf16 %v1053_v47, %v1050_v46 }
 0x23d   : > { %v1061_v50 = vpop.xlane.xlu1 %1060 }
 0x23e   : > { %1688 = vmatpush3.bf16.msra.mxu1 %v1687_v48 }
 0x23f   : > { %v1058_v51 = vpop.xlane.xlu0 %1057  ;;  %1689 = vmatprep.subr.bf16.mxu1 %v1766_v45 }
 0x240   : > { %v1690_v52 = vpack.c.bf16 %v1061_v50, %v1058_v51 }
 0x241   : > { %1667 = vmatmul.mubr.msk.f32.vlgmr.msra.gmra.mrb[4].mxu1 %vm423_vm1, %v1062_v49 }
 0x242   : > { %1691 = vmatpush3.bf16.msra.mxu1 %v1690_v52  ;;  %1673 = vmatprep.mubr.msk.f32.mxu1 %vm1761_vm0, %v1760_v1 }
 0x245   : > { %1674 = vmatmul.mubr.msk.f32.vlgmr.msra.gmra.mrb[6].mxu1 %vm423_vm1, %v1062_v49 }
 0x246   : > { %1678 = vmatprep.mubr.msk.f32.mxu1 %vm1216_vm4, %v1214_v53 }
 0x314   : > { %v1132_v54 = vpop.f32.mrb[4].mxu1 }
 0x315   : > { %v1207_v55 = vmul.f32 0.0078125, %v1132_v54  ;;  %v1668_v56 = vpop.f32.mrb[5].mxu1 }
 0x317   : > { %1676 = vmatprep.subr.mxu1 %v1207_v55  ;;  %v1209_v59 = vmul.f32 %v1207_v55, %v1207_v55 }
 0x318   : > { %v1202_v58 = vpop.f32.mrb[6].mxu1  ;;  %1677 = vmatpush3.msra.mxu1 %v1207_v55 }
 0x319   : > { %v1208_v1 = vmul.f32 0.0078125, %v1202_v58  ;;  %v1675_v60 = vpop.f32.mrb[7].mxu1  ;;  %1679 = vmatmul.mubr.msk.f32.vlgmr.msra.gmra.mrb[8].mxu1 %vm1216_vm4, %v1215_v57 }
 0x31a   : > { %1683 = vmatprep.mubr.msk.f32.mxu1 %vm1216_vm4, %v1214_v53 }
 0x31b   : > { %v1210_v61 = vsub.f32 %v1208_v1, %v1209_v59 }
 0x31d   : > { %v1211_v62 = vmax.f32 %v1210_v61, 0.0 }
 0x31f   : > { %v1212_v63 = vadd.f32 1e-05, %v1211_v62 }
 0x321   : > { %1750 = vrsqrt.f32 %v1212_v63 }
 0x32b   : > { %v1751_v0 = vpop.eup %1750 }
 0x32c   : > { %1681 = vmatprep.subr.mxu1 %v1751_v0 }
 0x32d   : > { %1682 = vmatpush3.msra.mxu1 %v1751_v0 }
 0x32e   : > { %1684 = vmatmul.mubr.msk.f32.vlgmr.msra.gmra.mrb[10].mxu1 %vm1216_vm4, %v1215_v57 }
 0x3ec   : > { %v1680_v2 = vpop.f32.mrb[8].mxu1 }
 0x3ed   : > { %v1289_v3 = vpop.f32.mrb[9].mxu1 }
 0x401   : > { %v1685_v6 = vpop.f32.mrb[10].mxu1 }
 0x402   : > { %v1376_v9 = vmul.f32 %v1685_v6, %v1374_v4  ;;  %v1364_v10 = vpop.f32.mrb[11].mxu1 }
 0x403   : > { %v1375_v11 = vmul.f32 %v1373_v7, %v1364_v10 }
 0x404   : > { %v1380_v12 = vmul.f32 %v1680_v2, %v1376_v9  ;;  %1390 = vperm.xlu1 %1738, %v1376_v9  }
 0x405   : > { %v1379_v14 = vmul.f32 %v1375_v11, %v1289_v3  ;;  %1385 = vperm.xlu0 %1737, %v1375_v11  }
 0x406   : > { %v1382_v15 = vsub.f32 %v1378_v8, %v1380_v12 }
 0x407   : > { %v1381_v16 = vsub.f32 %v1377_v13, %v1379_v14 }
 0x409   : > { %1402 = vperm.xlu0 %1737, %v1382_v15   ;;  %1397 = vperm.xlu1 %1738, %v1381_v16  }
 0x483   : > { %v1391_v17 = vpop.permute.xlu1 %1390 }
 0x484   : > { %v1386_v18 = vpop.permute.xlu0 %1385  ;;  %v1394_v19 = vmul.f32 %v1391_v17, %v1971_v39 }
 0x485   : > { %v1393_v20 = vmul.f32 %v1386_v18, %v1969_v37 }
 0x488   : > { %v1403_v21 = vpop.permute.xlu0 %1402  ;;  %v1398_v22 = vpop.permute.xlu1 %1397 }
 0x489   : > { %v1406_v23 = vadd.f32 %v1403_v21, %v1394_v19  ;;  %v1405_v24 = vadd.f32 %v1398_v22, %v1393_v20 }
 0x48b   : > { %v1408_v25 = vmul.f32 0.01, %v1406_v23  ;;  %v1407_v26 = vmul.f32 0.01, %v1405_v24 }
 0x48d   : > { %v1410_v27 = vmax.f32 %v1406_v23, %v1408_v25  ;;  %v1409_v28 = vmax.f32 %v1405_v24, %v1407_v26 }
 0x48f   : > { %1412 = vst.msk [vmem:[%s382_s16 + $0x8] sm:$0xff] %vm1047_vm3, %v1410_v27  ;;  %1411 = vst.msk [vmem:[%s382_s16] sm:$0xff] %vm1047_vm3, %v1409_v28 }
 0x490 PF: > { %s21_s13 = sadd.s32 1, %s1758_s13  }
 0x491   : > { %p18_p4 = scmp.ge.s32.totalorder %s21_s13, 4  }
 0x493   :  { %20 = sbr.rel (!%p18_p4) target bundleno = 1 (0x1), region = 115 }

</bundles_post_ra>
